<compile_context>
chip_gen: v7x
topology: tpu7x:2x2x1
jax: 0.10.0
libtpu: 0.0.40
codegen_flags: <defaults>
</compile_context>

<pallas_src>
import jax
import jax.numpy as jnp
import numpy as np
from jax.experimental import pallas as pl
from jax.experimental.pallas import tpu as pltpu

K = 5        # kernel_size of the ConvTranspose2d
STRIDE = 2   # stride of the ConvTranspose2d


def _polyphase_upsample_kernel(x_ref, w_ref, b_ref, o_ref):
    """One (batch, row-tile) grid step.

    x_ref: (A_pad+2, Wc_pad, 3*Cin)  column-pre-packed, 2-padded input image
    w_ref: (2, 3, 3*Cin, 2*Cout)     polyphase weights [rp, p, (q,cin), (cp,cout)]
    b_ref: (1, 2*Cout)               bias tiled over cp, float32
    o_ref: (TA, 2, Wc_pad, 2*Cout)   output tile [a, rp, b, (cp,cout)]
    """
    TA = o_ref.shape[0]
    Wc = x_ref.shape[1]
    cin3 = x_ref.shape[2]
    co2 = w_ref.shape[-1]

    row0 = pl.program_id(1) * TA
    bias = b_ref[...]                                  # (1, 2*Cout) f32

    # Per-p chunks (3 aligned leading-dim slices; no sublane-offset copies, no
    # 9-way concat), accumulated into two f32 results (one per row parity).
    acc = [None, None]
    for p in range(3):
        patch = x_ref[pl.ds(row0 + p, TA), :, :].reshape(TA * Wc, cin3)
        for rp in range(2):
            d = jnp.dot(patch, w_ref[rp, p], preferred_element_type=jnp.float32)
            acc[rp] = d if acc[rp] is None else acc[rp] + d

    # (cp, cout) are already interleaved on the lane axis by the weight packing,
    # so only a leading-dim split (rows -> (a, b)) is needed before the store.
    for rp in range(2):
        o_ref[:, rp, :, :] = (acc[rp] + bias).reshape(TA, Wc, co2).astype(o_ref.dtype)


def _pack_polyphase_weights(w_pt):
    """PyTorch ConvTranspose2d weight (Cin, Cout, 5, 5) -> (2, 3, 3*Cin, 2*Cout).

    Layout: [rp, p, (q, cin), (cp, cout)] where (p, q) are the shared 3x3 tap
    offsets into the 2-padded input and (rp, cp) the output row/col parities.
    Taps a parity does not use are zero.
    """
    Cin, Cout = w_pt.shape[0], w_pt.shape[1]
    rp_blocks = []
    for rp in range(2):
        p_blocks = []
        for p in range(3):
            kh = (4 + rp) - 2 * p
            q_blocks = []
            for q in range(3):
                cp_blocks = []
                for cp in range(2):
                    kw = (4 + cp) - 2 * q
                    if 0 <= kh < K and 0 <= kw < K:
                        blk = w_pt[:, :, kh, kw]                    # (Cin, Cout)
                    else:
                        blk = jnp.zeros((Cin, Cout), w_pt.dtype)
                    cp_blocks.append(blk)
                q_blocks.append(jnp.concatenate(cp_blocks, axis=1))  # (Cin, 2*Cout)
            p_blocks.append(jnp.concatenate(q_blocks, axis=0))       # (3*Cin, 2*Cout)
        rp_blocks.append(jnp.stack(p_blocks, axis=0))                # (3, 3*Cin, 2*Cout)
    return jnp.stack(rp_blocks, axis=0)                              # (2, 3, ...)


def _pick_vmem_limit():
    """Generation-aware VMEM budget: ~40 MiB on 64 MiB parts (v7x), ~96 MiB on
    128 MiB parts (v5e/v6e), conservative 48 MiB if the query fails."""
    cap = None
    try:
        cap = pltpu.get_tpu_info().vmem_capacity_bytes
    except Exception:
        cap = None
    if cap is None:
        return 48 * 1024 * 1024
    if cap <= 64 * 1024 * 1024:
        return 40 * 1024 * 1024
    return 96 * 1024 * 1024


def transposed_upsample_nhwc(x_nhwc, w_pt, bias, *, tile_rows=32,
                             compute_dtype=jnp.bfloat16, out_dtype=None,
                             vmem_limit_bytes=None):
    """ConvTranspose2d(k=5, s=2) on NHWC input -> NHWC output (2H+3, 2W+3)."""
    N, H, W, Cin = x_nhwc.shape
    Cout = w_pt.shape[1]
    OH, OW = STRIDE * H + 3, STRIDE * W + 3

    A = H + 2                                 # phase rows (even-parity output rows)
    Wc = W + 2                                # phase cols
    Wc_pad = -(-Wc // 8) * 8                  # sublane/lane-friendly phase width

    # Row tile: multiple of 8, capped at ceil(A/2) so R >= 2 whenever A > 8
    # (keeps both v7x TensorCores busy even at N == 1).
    TA = min(int(tile_rows), -(-A // 2))
    TA = max(8, (TA // 8) * 8)
    R = -(-A // TA)
    A_pad = R * TA

    if compute_dtype is None:
        compute_dtype = x_nhwc.dtype
    if out_dtype is None:
        out_dtype = x_nhwc.dtype
    if vmem_limit_bytes is None:
        vmem_limit_bytes = _pick_vmem_limit()

    # 2-pad the ORIGINAL input (no zero insertion), cast to the MXU operand dtype
    # here (halves input DMA vs casting in-kernel), and pre-pack the three column
    # shifts on the channel axis so the kernel's im2col is 3 aligned row slices.
    xp = jnp.pad(x_nhwc.astype(compute_dtype),
                 ((0, 0), (2, A_pad - A + 2), (2, Wc_pad - Wc + 2), (0, 0)))
    xcols = jnp.concatenate([xp[:, :, q:q + Wc_pad, :] for q in range(3)], axis=-1)
    # xcols: (N, A_pad + 2, Wc_pad, 3*Cin)

    w_packed = _pack_polyphase_weights(w_pt).astype(compute_dtype)   # (2,3,3Cin,2Cout)
    b_packed = jnp.tile(bias.astype(jnp.float32), 2).reshape(1, 2 * Cout)

    out_itemsize = jnp.dtype(out_dtype).itemsize
    cost = pl.CostEstimate(
        flops=2 * N * A_pad * Wc_pad * (9 * Cin) * (4 * Cout),
        transcendentals=0,
        bytes_accessed=(xcols.size * xcols.dtype.itemsize
                        + w_packed.size * w_packed.dtype.itemsize
                        + b_packed.size * 4
                        + N * A_pad * 2 * Wc_pad * 2 * Cout * out_itemsize))

    def _run(single_buffer_constants):
        # Constant-index blocks don't need double buffers; Buffered(1) reclaims
        # their second VMEM buffer (biggest win: whole-image input on v7x).
        bs_kw = {"pipeline_mode": pl.Buffered(1)} if single_buffer_constants else {}
        in_specs = [
            pl.BlockSpec((None, A_pad + 2, Wc_pad, 3 * Cin),
                         lambda n, r: (n, 0, 0, 0), **bs_kw),
            pl.BlockSpec((2, 3, 3 * Cin, 2 * Cout),
                         lambda n, r: (0, 0, 0, 0), **bs_kw),
            pl.BlockSpec((1, 2 * Cout), lambda n, r: (0, 0), **bs_kw),
        ]
        out_spec = pl.BlockSpec((None, TA, 2, Wc_pad, 2 * Cout),
                                lambda n, r: (n, r, 0, 0, 0))
        return pl.pallas_call(
            _polyphase_upsample_kernel,
            out_shape=jax.ShapeDtypeStruct((N, A_pad, 2, Wc_pad, 2 * Cout), out_dtype),
            grid=(N, R),
            in_specs=in_specs,
            out_specs=out_spec,
            compiler_params=pltpu.CompilerParams(
                dimension_semantics=("parallel", "parallel"),
                vmem_limit_bytes=vmem_limit_bytes),
            cost_estimate=cost,
        )(xcols, w_packed, b_packed)

    try:
        out = _run(True)
    except Exception:
        # This Pallas build does not honour pipeline_mode; fall back to defaults.
        out = _run(False)

    # (a, rp) and (b, cp) are already adjacent in row-major order -> free view,
    # then a crop of the bias-only padding rows/cols.
    out = out.reshape(N, 2 * A_pad, 2 * Wc_pad, Cout)
    return out[:, :OH, :OW, :]


def transposed_upsample(x_nchw, w_pt, bias, **kwargs):
    """PyTorch-layout entry point: NCHW in, NCHW out (matches the nn.Module)."""
    x_nhwc = jnp.transpose(x_nchw, (0, 2, 3, 1))
    y = transposed_upsample_nhwc(x_nhwc, w_pt, bias, **kwargs)
    return jnp.transpose(y, (0, 3, 1, 2))


def _reference(x_nchw, w_pt, bias):
    """Pure-JAX reference: ConvTranspose2d(k=5, s=2, pad=0) via lhs dilation."""
    Cout = w_pt.shape[1]
    rhs = jnp.transpose(w_pt, (1, 0, 2, 3))[:, :, ::-1, ::-1]     # (Cout, Cin, K, K)
    dn = jax.lax.conv_dimension_numbers(
        x_nchw.shape, rhs.shape, ('NCHW', 'OIHW', 'NCHW'))
    y = jax.lax.conv_general_dilated(
        x_nchw, rhs, window_strides=(1, 1),
        padding=[(K - 1, K - 1), (K - 1, K - 1)],
        lhs_dilation=(STRIDE, STRIDE),
        dimension_numbers=dn)
    return y + bias.reshape(1, Cout, 1, 1)


if __name__ == "__main__":
    key = jax.random.PRNGKey(0)
    k_x, k_w, k_b = jax.random.split(key, 3)

    N, C, H, W = 2, 4, 16, 16          # channels=4, out_channels defaults to channels
    Cout = C

    x = jax.random.normal(k_x, (N, C, H, W), dtype=jnp.float32)
    fan = C * K * K
    w = jax.random.normal(k_w, (C, Cout, K, K), dtype=jnp.float32) / np.sqrt(fan)
    b = jax.random.normal(k_b, (Cout,), dtype=jnp.float32) * 0.1

    ref = jax.block_until_ready(_reference(x, w, b))

    # Default path: bf16 MXU operands (all generations), f32 accumulation, f32 out.
    # 5e-2 tolerance is the expected bf16-operand rounding, not a kernel bug.
    out = jax.block_until_ready(transposed_upsample(x, w, b))
    assert out.shape == (N, Cout, 2 * H + 3, 2 * W + 3), out.shape
    np.testing.assert_allclose(np.asarray(out), np.asarray(ref), rtol=5e-2, atol=5e-2)

    # f32-operand path: exact to tight tolerance.
    out_f32 = jax.block_until_ready(
        transposed_upsample(x, w, b, compute_dtype=jnp.float32))
    np.testing.assert_allclose(np.asarray(out_f32), np.asarray(ref),
                               rtol=2e-4, atol=2e-4)

    # bf16 output (halves the dominant output HBM writeback when downstream allows).
    out_bf16 = jax.block_until_ready(
        transposed_upsample(x, w, b, out_dtype=jnp.bfloat16))
    np.testing.assert_allclose(np.asarray(out_bf16.astype(jnp.float32)),
                               np.asarray(ref), rtol=1e-1, atol=1e-1)

    print("KERNEL_OK")
</pallas_src>

<mosaic_0001>
module attributes {stable_mosaic.version = 11 : i64} {
  func.func @_polyphase_upsample_kernel(%arg0: i32, %arg1: i32, %arg2: memref<1x26x24x12xbf16, #tpu.memory_space<vmem>>, %arg3: memref<2x3x12x8xbf16, #tpu.memory_space<vmem>>, %arg4: memref<1x8xf32, #tpu.memory_space<vmem>>, %arg5: memref<1x8x2x24x8xf32, #tpu.memory_space<vmem>>) attributes {dimension_semantics = [#tpu.dimension_semantics<parallel>, #tpu.dimension_semantics<parallel>], iteration_bounds = array<i64: 2, 3>, scalar_prefetch = 0 : i64, scratch_operands = 0 : i64, tpu.core_type = #tpu.core_type<tc>, window_params = [{pipeline_mode = #tpu.pipeline_mode<synchronous>, transform_indices = @transform_0, window_bounds = array<i64: 1, 26, 24, 12>}, {pipeline_mode = #tpu.pipeline_mode<synchronous>, transform_indices = @transform_1, window_bounds = array<i64: 2, 3, 12, 8>}, {pipeline_mode = #tpu.pipeline_mode<synchronous>, transform_indices = @transform_2, window_bounds = array<i64: 1, 8>}, {transform_indices = @transform_3, window_bounds = array<i64: 1, 8, 2, 24, 8>}]} {
    %c8_i32 = arith.constant 8 : i32
    %0 = arith.muli %arg1, %c8_i32 : i32
    %c0 = arith.constant 0 : index
    %c0_0 = arith.constant 0 : index
    %1 = vector.load %arg4[%c0, %c0_0] : memref<1x8xf32, #tpu.memory_space<vmem>>, vector<1x8xf32>
    %c0_i32 = arith.constant 0 : i32
    %2 = arith.addi %0, %c0_i32 : i32
    %c0_1 = arith.constant 0 : index
    %3 = arith.index_cast %2 : i32 to index
    %c0_2 = arith.constant 0 : index
    %c0_3 = arith.constant 0 : index
    %4 = vector.load %arg2[%c0_1, %3, %c0_2, %c0_3] : memref<1x26x24x12xbf16, #tpu.memory_space<vmem>>, vector<1x8x24x12xbf16>
    %5 = vector.shape_cast %4 : vector<1x8x24x12xbf16> to vector<8x24x12xbf16>
    %6 = vector.shape_cast %5 : vector<8x24x12xbf16> to vector<192x12xbf16>
    %c0_4 = arith.constant 0 : index
    %c0_5 = arith.constant 0 : index
    %c0_6 = arith.constant 0 : index
    %c0_7 = arith.constant 0 : index
    %7 = vector.load %arg3[%c0_4, %c0_5, %c0_6, %c0_7] : memref<2x3x12x8xbf16, #tpu.memory_space<vmem>>, vector<1x1x12x8xbf16>
    %8 = vector.shape_cast %7 : vector<1x1x12x8xbf16> to vector<12x8xbf16>
    %cst = arith.constant dense<0.000000e+00> : vector<192x8xf32>
    %9 = tpu.matmul %6, %8, %cst {dimension_numbers = #tpu.dot_dimension_numbers<[1], [0], [0], [1], [0, 0, 1, 1], [], []>} : vector<192x12xbf16>, vector<12x8xbf16>, vector<192x8xf32> -> vector<192x8xf32>
    %c1 = arith.constant 1 : index
    %c0_8 = arith.constant 0 : index
    %c0_9 = arith.constant 0 : index
    %c0_10 = arith.constant 0 : index
    %10 = vector.load %arg3[%c1, %c0_8, %c0_9, %c0_10] : memref<2x3x12x8xbf16, #tpu.memory_space<vmem>>, vector<1x1x12x8xbf16>
    %11 = vector.shape_cast %10 : vector<1x1x12x8xbf16> to vector<12x8xbf16>
    %cst_11 = arith.constant dense<0.000000e+00> : vector<192x8xf32>
    %12 = tpu.matmul %6, %11, %cst_11 {dimension_numbers = #tpu.dot_dimension_numbers<[1], [0], [0], [1], [0, 0, 1, 1], [], []>} : vector<192x12xbf16>, vector<12x8xbf16>, vector<192x8xf32> -> vector<192x8xf32>
    %c1_i32 = arith.constant 1 : i32
    %13 = arith.addi %0, %c1_i32 : i32
    %c0_12 = arith.constant 0 : index
    %14 = arith.index_cast %13 : i32 to index
    %c0_13 = arith.constant 0 : index
    %c0_14 = arith.constant 0 : index
    %15 = vector.load %arg2[%c0_12, %14, %c0_13, %c0_14] : memref<1x26x24x12xbf16, #tpu.memory_space<vmem>>, vector<1x8x24x12xbf16>
    %16 = vector.shape_cast %15 : vector<1x8x24x12xbf16> to vector<8x24x12xbf16>
    %17 = vector.shape_cast %16 : vector<8x24x12xbf16> to vector<192x12xbf16>
    %c0_15 = arith.constant 0 : index
    %c1_16 = arith.constant 1 : index
    %c0_17 = arith.constant 0 : index
    %c0_18 = arith.constant 0 : index
    %18 = vector.load %arg3[%c0_15, %c1_16, %c0_17, %c0_18] : memref<2x3x12x8xbf16, #tpu.memory_space<vmem>>, vector<1x1x12x8xbf16>
    %19 = vector.shape_cast %18 : vector<1x1x12x8xbf16> to vector<12x8xbf16>
    %cst_19 = arith.constant dense<0.000000e+00> : vector<192x8xf32>
    %20 = tpu.matmul %17, %19, %cst_19 {dimension_numbers = #tpu.dot_dimension_numbers<[1], [0], [0], [1], [0, 0, 1, 1], [], []>} : vector<192x12xbf16>, vector<12x8xbf16>, vector<192x8xf32> -> vector<192x8xf32>
    %21 = arith.addf %9, %20 : vector<192x8xf32>
    %c1_20 = arith.constant 1 : index
    %c1_21 = arith.constant 1 : index
    %c0_22 = arith.constant 0 : index
    %c0_23 = arith.constant 0 : index
    %22 = vector.load %arg3[%c1_20, %c1_21, %c0_22, %c0_23] : memref<2x3x12x8xbf16, #tpu.memory_space<vmem>>, vector<1x1x12x8xbf16>
    %23 = vector.shape_cast %22 : vector<1x1x12x8xbf16> to vector<12x8xbf16>
    %cst_24 = arith.constant dense<0.000000e+00> : vector<192x8xf32>
    %24 = tpu.matmul %17, %23, %cst_24 {dimension_numbers = #tpu.dot_dimension_numbers<[1], [0], [0], [1], [0, 0, 1, 1], [], []>} : vector<192x12xbf16>, vector<12x8xbf16>, vector<192x8xf32> -> vector<192x8xf32>
    %25 = arith.addf %12, %24 : vector<192x8xf32>
    %c2_i32 = arith.constant 2 : i32
    %26 = arith.addi %0, %c2_i32 : i32
    %c0_25 = arith.constant 0 : index
    %27 = arith.index_cast %26 : i32 to index
    %c0_26 = arith.constant 0 : index
    %c0_27 = arith.constant 0 : index
    %28 = vector.load %arg2[%c0_25, %27, %c0_26, %c0_27] : memref<1x26x24x12xbf16, #tpu.memory_space<vmem>>, vector<1x8x24x12xbf16>
    %29 = vector.shape_cast %28 : vector<1x8x24x12xbf16> to vector<8x24x12xbf16>
    %30 = vector.shape_cast %29 : vector<8x24x12xbf16> to vector<192x12xbf16>
    %c0_28 = arith.constant 0 : index
    %c2 = arith.constant 2 : index
    %c0_29 = arith.constant 0 : index
    %c0_30 = arith.constant 0 : index
    %31 = vector.load %arg3[%c0_28, %c2, %c0_29, %c0_30] : memref<2x3x12x8xbf16, #tpu.memory_space<vmem>>, vector<1x1x12x8xbf16>
    %32 = vector.shape_cast %31 : vector<1x1x12x8xbf16> to vector<12x8xbf16>
    %cst_31 = arith.constant dense<0.000000e+00> : vector<192x8xf32>
    %33 = tpu.matmul %30, %32, %cst_31 {dimension_numbers = #tpu.dot_dimension_numbers<[1], [0], [0], [1], [0, 0, 1, 1], [], []>} : vector<192x12xbf16>, vector<12x8xbf16>, vector<192x8xf32> -> vector<192x8xf32>
    %34 = arith.addf %21, %33 : vector<192x8xf32>
    %c1_32 = arith.constant 1 : index
    %c2_33 = arith.constant 2 : index
    %c0_34 = arith.constant 0 : index
    %c0_35 = arith.constant 0 : index
    %35 = vector.load %arg3[%c1_32, %c2_33, %c0_34, %c0_35] : memref<2x3x12x8xbf16, #tpu.memory_space<vmem>>, vector<1x1x12x8xbf16>
    %36 = vector.shape_cast %35 : vector<1x1x12x8xbf16> to vector<12x8xbf16>
    %cst_36 = arith.constant dense<0.000000e+00> : vector<192x8xf32>
    %37 = tpu.matmul %30, %36, %cst_36 {dimension_numbers = #tpu.dot_dimension_numbers<[1], [0], [0], [1], [0, 0, 1, 1], [], []>} : vector<192x12xbf16>, vector<12x8xbf16>, vector<192x8xf32> -> vector<192x8xf32>
    %38 = arith.addf %25, %37 : vector<192x8xf32>
    %39 = vector.broadcast %1 : vector<1x8xf32> to vector<192x8xf32>
    %40 = arith.addf %34, %39 : vector<192x8xf32>
    %41 = vector.shape_cast %40 : vector<192x8xf32> to vector<8x24x8xf32>
    %c0_37 = arith.constant 0 : index
    %c0_38 = arith.constant 0 : index
    %c0_39 = arith.constant 0 : index
    %c0_40 = arith.constant 0 : index
    %c0_41 = arith.constant 0 : index
    %42 = vector.load %arg5[%c0_37, %c0_38, %c0_39, %c0_40, %c0_41] : memref<1x8x2x24x8xf32, #tpu.memory_space<vmem>>, vector<1x8x1x24x8xf32>
    %43 = vector.shape_cast %42 : vector<1x8x1x24x8xf32> to vector<8x24x8xf32>
    %44 = vector.shape_cast %41 : vector<8x24x8xf32> to vector<1x8x1x24x8xf32>
    tpu.vector_store %arg5[%c0_37, %c0_38, %c0_39, %c0_40, %c0_41], %44 {strides = array<i32>} : memref<1x8x2x24x8xf32, #tpu.memory_space<vmem>>, vector<1x8x1x24x8xf32>,
    %45 = vector.broadcast %1 : vector<1x8xf32> to vector<192x8xf32>
    %46 = arith.addf %38, %45 : vector<192x8xf32>
    %47 = vector.shape_cast %46 : vector<192x8xf32> to vector<8x24x8xf32>
    %c0_42 = arith.constant 0 : index
    %c0_43 = arith.constant 0 : index
    %c1_44 = arith.constant 1 : index
    %c0_45 = arith.constant 0 : index
    %c0_46 = arith.constant 0 : index
    %48 = vector.load %arg5[%c0_42, %c0_43, %c1_44, %c0_45, %c0_46] : memref<1x8x2x24x8xf32, #tpu.memory_space<vmem>>, vector<1x8x1x24x8xf32>
    %49 = vector.shape_cast %48 : vector<1x8x1x24x8xf32> to vector<8x24x8xf32>
    %50 = vector.shape_cast %47 : vector<8x24x8xf32> to vector<1x8x1x24x8xf32>
    tpu.vector_store %arg5[%c0_42, %c0_43, %c1_44, %c0_45, %c0_46], %50 {strides = array<i32>} : memref<1x8x2x24x8xf32, #tpu.memory_space<vmem>>, vector<1x8x1x24x8xf32>,
    return
  }
  func.func @transform_0(%arg0: i32, %arg1: i32) -> (i32, i32, i32, i32) {
    %c0_i32 = arith.constant 0 : i32
    %c0_i32_0 = arith.constant 0 : i32
    %c0_i32_1 = arith.constant 0 : i32
    %c0_i32_2 = arith.constant 0 : i32
    return %arg0, %c0_i32, %c0_i32_0, %c0_i32_1 : i32, i32, i32, i32
  }
  func.func @transform_1(%arg0: i32, %arg1: i32) -> (i32, i32, i32, i32) {
    %c0_i32 = arith.constant 0 : i32
    %c0_i32_0 = arith.constant 0 : i32
    %c0_i32_1 = arith.constant 0 : i32
    %c0_i32_2 = arith.constant 0 : i32
    %c0_i32_3 = arith.constant 0 : i32
    return %c0_i32, %c0_i32_0, %c0_i32_1, %c0_i32_2 : i32, i32, i32, i32
  }
  func.func @transform_2(%arg0: i32, %arg1: i32) -> (i32, i32) {
    %c0_i32 = arith.constant 0 : i32
    %c0_i32_0 = arith.constant 0 : i32
    %c0_i32_1 = arith.constant 0 : i32
    return %c0_i32, %c0_i32_0 : i32, i32
  }
  func.func @transform_3(%arg0: i32, %arg1: i32) -> (i32, i32, i32, i32, i32) {
    %c0_i32 = arith.constant 0 : i32
    %c0_i32_0 = arith.constant 0 : i32
    %c0_i32_1 = arith.constant 0 : i32
    %c0_i32_2 = arith.constant 0 : i32
    return %arg0, %arg1, %c0_i32, %c0_i32_0, %c0_i32_1 : i32, i32, i32, i32, i32
  }
}

module attributes {stable_mosaic.version = 11 : i64} {
  func.func @_polyphase_upsample_kernel(%arg0: i32, %arg1: i32, %arg2: memref<1x26x24x12xbf16, #tpu.memory_space<vmem>>, %arg3: memref<2x3x12x8xbf16, #tpu.memory_space<vmem>>, %arg4: memref<1x8xf32, #tpu.memory_space<vmem>>, %arg5: memref<1x8x2x24x8xf32, #tpu.memory_space<vmem>>) attributes {dimension_semantics = [#tpu.dimension_semantics<parallel>, #tpu.dimension_semantics<parallel>], iteration_bounds = array<i64: 2, 3>, scalar_prefetch = 0 : i64, scratch_operands = 0 : i64, tpu.core_type = #tpu.core_type<tc>, window_params = [{transform_indices = @transform_0, window_bounds = array<i64: 1, 26, 24, 12>}, {pipeline_mode = #tpu.pipeline_mode<synchronous>, transform_indices = @transform_1, window_bounds = array<i64: 2, 3, 12, 8>}, {pipeline_mode = #tpu.pipeline_mode<synchronous>, transform_indices = @transform_2, window_bounds = array<i64: 1, 8>}, {transform_indices = @transform_3, window_bounds = array<i64: 1, 8, 2, 24, 8>}]} {
    %c8_i32 = arith.constant 8 : i32
    %0 = arith.muli %arg1, %c8_i32 : i32
    %c0 = arith.constant 0 : index
    %c0_0 = arith.constant 0 : index
    %1 = vector.load %arg4[%c0, %c0_0] : memref<1x8xf32, #tpu.memory_space<vmem>>, vector<1x8xf32>
    %c0_i32 = arith.constant 0 : i32
    %2 = arith.addi %0, %c0_i32 : i32
    %c0_1 = arith.constant 0 : index
    %3 = arith.index_cast %2 : i32 to index
    %c0_2 = arith.constant 0 : index
    %c0_3 = arith.constant 0 : index
    %4 = vector.load %arg2[%c0_1, %3, %c0_2, %c0_3] : memref<1x26x24x12xbf16, #tpu.memory_space<vmem>>, vector<1x8x24x12xbf16>
    %5 = vector.shape_cast %4 : vector<1x8x24x12xbf16> to vector<8x24x12xbf16>
    %6 = vector.shape_cast %5 : vector<8x24x12xbf16> to vector<192x12xbf16>
    %c0_4 = arith.constant 0 : index
    %c0_5 = arith.constant 0 : index
    %c0_6 = arith.constant 0 : index
    %c0_7 = arith.constant 0 : index
    %7 = vector.load %arg3[%c0_4, %c0_5, %c0_6, %c0_7] : memref<2x3x12x8xbf16, #tpu.memory_space<vmem>>, vector<1x1x12x8xbf16>
    %8 = vector.shape_cast %7 : vector<1x1x12x8xbf16> to vector<12x8xbf16>
    %cst = arith.constant dense<0.000000e+00> : vector<192x8xf32>
    %9 = tpu.matmul %6, %8, %cst {dimension_numbers = #tpu.dot_dimension_numbers<[1], [0], [0], [1], [0, 0, 1, 1], [], []>} : vector<192x12xbf16>, vector<12x8xbf16>, vector<192x8xf32> -> vector<192x8xf32>
    %c1 = arith.constant 1 : index
    %c0_8 = arith.constant 0 : index
    %c0_9 = arith.constant 0 : index
    %c0_10 = arith.constant 0 : index
    %10 = vector.load %arg3[%c1, %c0_8, %c0_9, %c0_10] : memref<2x3x12x8xbf16, #tpu.memory_space<vmem>>, vector<1x1x12x8xbf16>
    %11 = vector.shape_cast %10 : vector<1x1x12x8xbf16> to vector<12x8xbf16>
    %cst_11 = arith.constant dense<0.000000e+00> : vector<192x8xf32>
    %12 = tpu.matmul %6, %11, %cst_11 {dimension_numbers = #tpu.dot_dimension_numbers<[1], [0], [0], [1], [0, 0, 1, 1], [], []>} : vector<192x12xbf16>, vector<12x8xbf16>, vector<192x8xf32> -> vector<192x8xf32>
    %c1_i32 = arith.constant 1 : i32
    %13 = arith.addi %0, %c1_i32 : i32
    %c0_12 = arith.constant 0 : index
    %14 = arith.index_cast %13 : i32 to index
    %c0_13 = arith.constant 0 : index
    %c0_14 = arith.constant 0 : index
    %15 = vector.load %arg2[%c0_12, %14, %c0_13, %c0_14] : memref<1x26x24x12xbf16, #tpu.memory_space<vmem>>, vector<1x8x24x12xbf16>
    %16 = vector.shape_cast %15 : vector<1x8x24x12xbf16> to vector<8x24x12xbf16>
    %17 = vector.shape_cast %16 : vector<8x24x12xbf16> to vector<192x12xbf16>
    %c0_15 = arith.constant 0 : index
    %c1_16 = arith.constant 1 : index
    %c0_17 = arith.constant 0 : index
    %c0_18 = arith.constant 0 : index
    %18 = vector.load %arg3[%c0_15, %c1_16, %c0_17, %c0_18] : memref<2x3x12x8xbf16, #tpu.memory_space<vmem>>, vector<1x1x12x8xbf16>
    %19 = vector.shape_cast %18 : vector<1x1x12x8xbf16> to vector<12x8xbf16>
    %cst_19 = arith.constant dense<0.000000e+00> : vector<192x8xf32>
    %20 = tpu.matmul %17, %19, %cst_19 {dimension_numbers = #tpu.dot_dimension_numbers<[1], [0], [0], [1], [0, 0, 1, 1], [], []>} : vector<192x12xbf16>, vector<12x8xbf16>, vector<192x8xf32> -> vector<192x8xf32>
    %21 = arith.addf %9, %20 : vector<192x8xf32>
    %c1_20 = arith.constant 1 : index
    %c1_21 = arith.constant 1 : index
    %c0_22 = arith.constant 0 : index
    %c0_23 = arith.constant 0 : index
    %22 = vector.load %arg3[%c1_20, %c1_21, %c0_22, %c0_23] : memref<2x3x12x8xbf16, #tpu.memory_space<vmem>>, vector<1x1x12x8xbf16>
    %23 = vector.shape_cast %22 : vector<1x1x12x8xbf16> to vector<12x8xbf16>
    %cst_24 = arith.constant dense<0.000000e+00> : vector<192x8xf32>
    %24 = tpu.matmul %17, %23, %cst_24 {dimension_numbers = #tpu.dot_dimension_numbers<[1], [0], [0], [1], [0, 0, 1, 1], [], []>} : vector<192x12xbf16>, vector<12x8xbf16>, vector<192x8xf32> -> vector<192x8xf32>
    %25 = arith.addf %12, %24 : vector<192x8xf32>
    %c2_i32 = arith.constant 2 : i32
    %26 = arith.addi %0, %c2_i32 : i32
    %c0_25 = arith.constant 0 : index
    %27 = arith.index_cast %26 : i32 to index
    %c0_26 = arith.constant 0 : index
    %c0_27 = arith.constant 0 : index
    %28 = vector.load %arg2[%c0_25, %27, %c0_26, %c0_27] : memref<1x26x24x12xbf16, #tpu.memory_space<vmem>>, vector<1x8x24x12xbf16>
    %29 = vector.shape_cast %28 : vector<1x8x24x12xbf16> to vector<8x24x12xbf16>
    %30 = vector.shape_cast %29 : vector<8x24x12xbf16> to vector<192x12xbf16>
    %c0_28 = arith.constant 0 : index
    %c2 = arith.constant 2 : index
    %c0_29 = arith.constant 0 : index
    %c0_30 = arith.constant 0 : index
    %31 = vector.load %arg3[%c0_28, %c2, %c0_29, %c0_30] : memref<2x3x12x8xbf16, #tpu.memory_space<vmem>>, vector<1x1x12x8xbf16>
    %32 = vector.shape_cast %31 : vector<1x1x12x8xbf16> to vector<12x8xbf16>
    %cst_31 = arith.constant dense<0.000000e+00> : vector<192x8xf32>
    %33 = tpu.matmul %30, %32, %cst_31 {dimension_numbers = #tpu.dot_dimension_numbers<[1], [0], [0], [1], [0, 0, 1, 1], [], []>} : vector<192x12xbf16>, vector<12x8xbf16>, vector<192x8xf32> -> vector<192x8xf32>
    %34 = arith.addf %21, %33 : vector<192x8xf32>
    %c1_32 = arith.constant 1 : index
    %c2_33 = arith.constant 2 : index
    %c0_34 = arith.constant 0 : index
    %c0_35 = arith.constant 0 : index
    %35 = vector.load %arg3[%c1_32, %c2_33, %c0_34, %c0_35] : memref<2x3x12x8xbf16, #tpu.memory_space<vmem>>, vector<1x1x12x8xbf16>
    %36 = vector.shape_cast %35 : vector<1x1x12x8xbf16> to vector<12x8xbf16>
    %cst_36 = arith.constant dense<0.000000e+00> : vector<192x8xf32>
    %37 = tpu.matmul %30, %36, %cst_36 {dimension_numbers = #tpu.dot_dimension_numbers<[1], [0], [0], [1], [0, 0, 1, 1], [], []>} : vector<192x12xbf16>, vector<12x8xbf16>, vector<192x8xf32> -> vector<192x8xf32>
    %38 = arith.addf %25, %37 : vector<192x8xf32>
    %39 = vector.broadcast %1 : vector<1x8xf32> to vector<192x8xf32>
    %40 = arith.addf %34, %39 : vector<192x8xf32>
    %41 = vector.shape_cast %40 : vector<192x8xf32> to vector<8x24x8xf32>
    %c0_37 = arith.constant 0 : index
    %c0_38 = arith.constant 0 : index
    %c0_39 = arith.constant 0 : index
    %c0_40 = arith.constant 0 : index
    %c0_41 = arith.constant 0 : index
    %42 = vector.load %arg5[%c0_37, %c0_38, %c0_39, %c0_40, %c0_41] : memref<1x8x2x24x8xf32, #tpu.memory_space<vmem>>, vector<1x8x1x24x8xf32>
    %43 = vector.shape_cast %42 : vector<1x8x1x24x8xf32> to vector<8x24x8xf32>
    %44 = vector.shape_cast %41 : vector<8x24x8xf32> to vector<1x8x1x24x8xf32>
    tpu.vector_store %arg5[%c0_37, %c0_38, %c0_39, %c0_40, %c0_41], %44 {strides = array<i32>} : memref<1x8x2x24x8xf32, #tpu.memory_space<vmem>>, vector<1x8x1x24x8xf32>,
    %45 = vector.broadcast %1 : vector<1x8xf32> to vector<192x8xf32>
    %46 = arith.addf %38, %45 : vector<192x8xf32>
    %47 = vector.shape_cast %46 : vector<192x8xf32> to vector<8x24x8xf32>
    %c0_42 = arith.constant 0 : index
    %c0_43 = arith.constant 0 : index
    %c1_44 = arith.constant 1 : index
    %c0_45 = arith.constant 0 : index
    %c0_46 = arith.constant 0 : index
    %48 = vector.load %arg5[%c0_42, %c0_43, %c1_44, %c0_45, %c0_46] : memref<1x8x2x24x8xf32, #tpu.memory_space<vmem>>, vector<1x8x1x24x8xf32>
    %49 = vector.shape_cast %48 : vector<1x8x1x24x8xf32> to vector<8x24x8xf32>
    %50 = vector.shape_cast %47 : vector<8x24x8xf32> to vector<1x8x1x24x8xf32>
    tpu.vector_store %arg5[%c0_42, %c0_43, %c1_44, %c0_45, %c0_46], %50 {strides = array<i32>} : memref<1x8x2x24x8xf32, #tpu.memory_space<vmem>>, vector<1x8x1x24x8xf32>,
    return
  }
  func.func @transform_0(%arg0: i32, %arg1: i32) -> (i32, i32, i32, i32) {
    %c0_i32 = arith.constant 0 : i32
    %c0_i32_0 = arith.constant 0 : i32
    %c0_i32_1 = arith.constant 0 : i32
    %c0_i32_2 = arith.constant 0 : i32
    return %arg0, %c0_i32, %c0_i32_0, %c0_i32_1 : i32, i32, i32, i32
  }
  func.func @transform_1(%arg0: i32, %arg1: i32) -> (i32, i32, i32, i32) {
    %c0_i32 = arith.constant 0 : i32
    %c0_i32_0 = arith.constant 0 : i32
    %c0_i32_1 = arith.constant 0 : i32
    %c0_i32_2 = arith.constant 0 : i32
    %c0_i32_3 = arith.constant 0 : i32
    return %c0_i32, %c0_i32_0, %c0_i32_1, %c0_i32_2 : i32, i32, i32, i32
  }
  func.func @transform_2(%arg0: i32, %arg1: i32) -> (i32, i32) {
    %c0_i32 = arith.constant 0 : i32
    %c0_i32_0 = arith.constant 0 : i32
    %c0_i32_1 = arith.constant 0 : i32
    return %c0_i32, %c0_i32_0 : i32, i32
  }
  func.func @transform_3(%arg0: i32, %arg1: i32) -> (i32, i32, i32, i32, i32) {
    %c0_i32 = arith.constant 0 : i32
    %c0_i32_0 = arith.constant 0 : i32
    %c0_i32_1 = arith.constant 0 : i32
    %c0_i32_2 = arith.constant 0 : i32
    return %arg0, %arg1, %c0_i32, %c0_i32_0, %c0_i32_1 : i32, i32, i32, i32, i32
  }
}

</mosaic_0001>

<bundles_post_ra>
// kernel: tpu_custom_call.1
= control target key start
LH: loop header
LB: loop body
LE: loop exit
PB: predicated region body
PF: predicated region fallthrough
CT: control target
= control target key end

     0   :  { %8 = vsyncpa [#allocation3], 0  ;;  %s2432_s12 = smov 0   ;;  %s2434_s13 = smov 0   ;;  %s2822_s0 = inlined_call_operand.vmem [shape: bf16[2,26,24,12], index: 0, kind: input, shape index: {}]   ;;  %s2823_s1 = inlined_call_operand.vmem [shape: bf16[2,3,12,8], index: 1, kind: input, shape index: {}]   ;;  %s2824_s2 = inlined_call_operand.hbm [shape: f32[1,8], index: 2, kind: input, shape index: {}]   ;;  %s2825_s3 = inlined_call_operand.vmem [shape: f32[2,24,2,24,8], index: 3, kind: output, shape index: {}]  }
   0x1   :  { %s2436_s14 = smov 0   ;;  %s2438_s15 = smov 0  }
   0x2   :  { %s2440_s16 = smov 0  }
   0x3 LB: > { %s1691_s17 = sadd.s32 4294967295, %s2409_s16   ;;  %s23_s18 = sadd.s32 1, %s2401_s14  ;;  %s2409_s16 = sphi %s2440_s16, %s14_s16   ;;  %s2405_s15 = sphi %s2438_s15, %s2837_s15   ;;  %s2401_s14 = sphi %s2436_s14, %s2836_s14   ;;  %s2397_s13 = sphi %s2434_s13, %s2835_s13   ;;  %s2393_s12 = sphi %s2432_s12, %s2834_s12  }
   0x4   : > { %p24_p0 = scmp.ge.s32.totalorder %s23_s18, 3  ;;  %s26_s19 = sadd.s32 1, %s2405_s15 }
   0x5   : > { %p1693_p1 = scmp.ge.s32.totalorder %s2409_s16, 1  ;;  %p127_p2 = scmp.lt.s32.totalorder %s2409_s16, 7 }
   0x6   : > { %s2839_s18 = smov (%p24_p0, %s23_s18), 0  ;;  %s2841_s19 = smov (!%p24_p0, %s26_s19), %s2405_s15 }
   0x7   : > { %p2465_p3 = pnand %p1693_p1, %p127_p2  ;;  %p28_p4 = scmp.ge.s32.totalorder %s2841_s19, 2 }
   0x8   : > { %p2469_p5 = scmp.eq.s32.totalorder %s1691_s17, 0  ;;  %s2411_s22 = smov [#allocation2]  }
   0x9   : > { %s2829_s20 = scalar_select %p2465_p3, 1, 0 }
   0xa   : > { %s2830_s21 = scalar_select %p2469_p5, 1, 0 }
   0xb   : > { %p2250_p6 = pneg %p2465_p3  ;;  %s2843_s19 = smov (%p28_p4, %s2841_s19), 0 }
   0xc   : > { %s151_s23 = sshll.u32 %s2411_s22, 4  ;;  %s2339_s27 = scalar_lea.hbm %s2824_s2, 16  ;;  %s152_s23 = int_to_ptr.vmem [resolvable:$true] %s151_s23 }
   0xd   : > { %p2479_p7 = pnand %p2469_p5, %p2250_p6  ;;  %p2340_p8 = scmp.ne.s32.totalorder %s2824_s2, %s2339_s27 }
   0xe   : > { %p2346_p12 = scmp.lt.u32.totalorder %s2339_s27, %s2824_s2 }
   0xf   : > { %p2341_p9 = pneg %p2479_p7 }
  0x11   : > { %p2342_p10 = pnand %p2341_p9, %p2340_p8 }
  0x13   : > { %p2343_p11 = pneg %p2342_p10 }
  0x15   : > { %p2348_p13 = pnand %p2346_p12, %p2343_p11 }
  0x17   : > { %2351 = shalt.err (!%p2348_p13)
}
  0x18   : > { %s2352_s5 = scalar_lea.vmem %s152_s23, 16  ;;  %s2359_s6 = scalar_lea.vmem %s152_s23, 32 }
  0x19   : > { %p2353_p0 = scmp.ne.s32.totalorder %s152_s23, %s2352_s5  ;;  %p2360_p4 = scmp.lt.s32.totalorder %s152_s23, %s152_s23 }
  0x1a   : > { %p2361_p6 = scmp.lt.s32.totalorder %s2359_s6, %s2352_s5 }
  0x1b   : > { %p2355_p1 = pnand %p2353_p0, %p2341_p9 }
  0x1c   : > { %p2362_p5 = por %p2361_p6, %p2360_p4 }
  0x1d   : > { %p2356_p2 = pneg %p2355_p1 }
  0x1f   : > { %p2363_p3 = pnand %p2362_p5, %p2356_p2 }
  0x21   : > { %2366 = shalt.err (!%p2363_p3)
}
  0x22   : > { %2253 = dma.hbm_to_vmem [thread:$0]  (!%p2479_p7), %s2824_s2, 16, %s152_s23, [#allocation3]  }
  0x23   : > { %p2832_p8 = scmp.ne.s32.totalorder %s2829_s20, 0 }
  0x24   : > { %p2833_p10 = scmp.ne.s32.totalorder (!%p2832_p8), %s2830_s21, 0 }
  0x25   : > { %164 = sbr.rel (%p2832_p8) target bundleno = 408 (0x198), region = 32 }
  0x2c   : > { %2388 = dma.done.wait (%p2833_p10), [#allocation3], 16  }
  0x2d   : > { %2390 = vsyncadd (%p2833_p10), [#allocation3], 4294967280  ;;  %p193_p5 = scmp.lt.s32.totalorder %s2397_s13, 1  ;;  %s1906_s9 = smul.u32 96, %s2393_s12  ;;  %vm377_vm0 = vcmask 1045504   ;;  %vm340_vm1 = vcmask 97280  }
  0x2e   : > { %v2297_v0 = vld [vmem:[%s2823_s1 + $0x8] sm:$0x3f]   ;;  %v2298_v1 = vld [vmem:[%s2823_s1 + $0x20] sm:$0x3f]   ;;  %v2302_v7 = vld [vmem:[%s2823_s1 + $0x18] sm:$0x3f]  }
  0x2f   : > { %s2845_s13 = smov (!%p193_p5, %s2397_s13), 1  ;;  %2237 = vmatprep.subr.msk.bf16.mxu0 %vm377_vm0, %v2297_v0  ;;  %v379_v2 = vsel %vm377_vm0, %v2297_v0, 0  ;;  %2239 = vmatprep.subr.msk.bf16.mxu1 %vm377_vm0, %v2298_v1  ;;  %v752_v4 = vsel %vm377_vm0, %v2298_v1, 0  ;;  %v2301_v6 = vld [vmem:[%s2823_s1] sm:$0x3f]   ;;  %v889_v10 = vsel %vm377_vm0, %v2302_v7, 0 }
  0x30   : > { %s2243_s10 = smul.u32 312, %s2845_s13  ;;  %1986 = vmatpush3.bf16.msra.mxu0 %v379_v2  ;;  %2038 = vmatpush3.bf16.msra.mxu1 %v752_v4  ;;  %v612_v8 = vsel %vm377_vm0, %v2301_v6, 0  ;;  %v2315_v15 = vld [vmem:[%s2823_s1 + $0x10] sm:$0x3f]   ;;  %v2316_v16 = vld [vmem:[%s2823_s1 + $0x28] sm:$0x3f]  }
  0x31   : > { %2238 = vmatprep.subr.msk.bf16.mxu0 %vm377_vm0, %v2301_v6  ;;  %2240 = vmatprep.subr.msk.bf16.mxu1 %vm377_vm0, %v2302_v7  ;;  %v1153_v24 = vsel %vm377_vm0, %v2315_v15, 0  ;;  %v1317_v26 = vsel %vm377_vm0, %v2316_v16, 0  ;;  %s1698_s7 = sshll.u32 %s2393_s12, 3  ;;  %s2245_s8 = smul.u32 144, %s2845_s13  ;;  %v2656_v48 = vld [vmem:[#allocation2] ss:$0 sm:$0xff] }
  0x32   : > { %s197_s20 = scalar_lea.vmem %s2822_s0, %s2243_s10  ;;  %p201_p3 = scmp.lt.s32.totalorder %s1698_s7, 23  ;;  %vm1502_vm2 = vcmask 64512  }
  0x33   : > { %s2517_s21 = scalar_lea.vmem %s197_s20, %s1906_s9 }
  0x34   : > { %v2299_v3 = vld [vmem:[%s2517_s21 + $0xc] sm:$0xff]   ;;  %v2300_v5 = vld [vmem:[%s2517_s21 + $0x14] sm:$0xff]   ;;  %v2303_v9 = vld [vmem:[%s2517_s21 + $0x1c] sm:$0xff]   ;;  %s2847_s7 = smov (!%p201_p3, %s1698_s7), 23 }
  0x35   : > { %1987 = vmatprep.mubr.msk.bf16.mxu0 %vm340_vm1, %v2299_v3  ;;  %2039 = vmatprep.mubr.msk.bf16.mxu1 %vm340_vm1, %v2299_v3  ;;  %v2304_v11 = vld [vmem:[%s2517_s21 + $0x24] sm:$0xff]   ;;  %v2305_v12 = vld [vmem:[%s2517_s21 + $0x2c] sm:$0xff]   ;;  %v2306_v13 = vld [vmem:[%s2517_s21 + $0x34] sm:$0xff]   ;;  %s2244_s9 = smul.u32 6, %s2847_s7 }
  0x36   : > { %1988 = vmatmul.mubr.msk.bf16.vlgmr.msra.gmra.mrb[0].mxu0 %vm340_vm1, %v2300_v5  ;;  %2040 = vmatmul.mubr.msk.bf16.vlgmr.msra.gmra.mrb[0].mxu1 %vm340_vm1, %v2300_v5  ;;  %v2307_v14 = vld [vmem:[%s2517_s21 + $0x3c] sm:$0xff]   ;;  %v2308_v17 = vld [vmem:[%s2517_s21 + $0x44] sm:$0xff]   ;;  %v2309_v18 = vld [vmem:[%s2517_s21 + $0x4c] sm:$0xff]  }
  0x37   : > { %2012 = vmatpush3.bf16.msra.mxu0 %v612_v8  ;;  %2064 = vmatpush3.bf16.msra.mxu1 %v889_v10  ;;  %v2310_v19 = vld [vmem:[%s2517_s21 + $0x54] sm:$0xff]   ;;  %v2311_v20 = vld [vmem:[%s2517_s21 + $0x5c] sm:$0xff]   ;;  %v2312_v21 = vld [vmem:[%s2517_s21 + $0x64] sm:$0xff]   ;;  %s205_s10 = sadd.s32 %s2245_s8, %s2244_s9 }
  0x38   : > { %1991 = vmatprep.mubr.msk.bf16.mxu0 %vm340_vm1, %v2303_v9  ;;  %2043 = vmatprep.mubr.msk.bf16.mxu1 %vm340_vm1, %v2303_v9  ;;  %v2313_v22 = vld [vmem:[%s2517_s21] sm:$0xff]   ;;  %v2314_v23 = vld [vmem:[%s2517_s21 + $0x8] sm:$0xff]   ;;  %v2317_v25 = vld [vmem:[%s2517_s21 + $0x10] sm:$0xff]   ;;  %s1699_s11 = sshll.u32 %s205_s10, 3 }
  0x39   : > { %2241 = vmatprep.subr.msk.bf16.mxu0 %vm377_vm0, %v2315_v15  ;;  %2242 = vmatprep.subr.msk.bf16.mxu1 %vm377_vm0, %v2316_v16  ;;  %v2318_v27 = vld [vmem:[%s2517_s21 + $0x18] sm:$0xff]   ;;  %v2319_v28 = vld [vmem:[%s2517_s21 + $0x20] sm:$0xff]   ;;  %v2320_v29 = vld [vmem:[%s2517_s21 + $0x28] sm:$0xff]   ;;  %s2661_s22 = scalar_lea.vmem %s2825_s3, %s1699_s11 }
  0x3a   : > { %v2321_v30 = vld [vmem:[%s2517_s21 + $0x30] sm:$0xff]   ;;  %v2322_v31 = vld [vmem:[%s2517_s21 + $0x38] sm:$0xff]   ;;  %v2323_v32 = vld [vmem:[%s2517_s21 + $0x40] sm:$0xff]  }
  0x3b   : > { %v2324_v33 = vld [vmem:[%s2517_s21 + $0x48] sm:$0xff]   ;;  %v2325_v34 = vld [vmem:[%s2517_s21 + $0x50] sm:$0xff]   ;;  %v2326_v35 = vld [vmem:[%s2517_s21 + $0x58] sm:$0xff]  }
  0x3c   : > { %v2327_v36 = vld [vmem:[%s2517_s21 + $0x18] sm:$0xff]   ;;  %v2328_v37 = vld [vmem:[%s2517_s21 + $0x20] sm:$0xff]   ;;  %v2329_v38 = vld [vmem:[%s2517_s21 + $0x28] sm:$0xff]  }
  0x3d   : > { %v2330_v39 = vld [vmem:[%s2517_s21 + $0x30] sm:$0xff]   ;;  %v2331_v40 = vld [vmem:[%s2517_s21 + $0x38] sm:$0xff]   ;;  %v2332_v41 = vld [vmem:[%s2517_s21 + $0x40] sm:$0xff]  }
  0x3e   : > { %1992 = vmatmul.mubr.msk.bf16.gmra.mrb[4].mxu0 %vm340_vm1, %v2304_v11  ;;  %2044 = vmatmul.mubr.msk.bf16.gmra.mrb[4].mxu1 %vm340_vm1, %v2304_v11  ;;  %v2333_v42 = vld [vmem:[%s2517_s21 + $0x48] sm:$0xff]   ;;  %v2334_v43 = vld [vmem:[%s2517_s21 + $0x50] sm:$0xff]   ;;  %v2335_v44 = vld [vmem:[%s2517_s21 + $0x58] sm:$0xff]  }
  0x3f   : > { %1995 = vmatprep.mubr.msk.bf16.mxu0 %vm340_vm1, %v2305_v12  ;;  %2047 = vmatprep.mubr.msk.bf16.mxu1 %vm340_vm1, %v2305_v12  ;;  %v2336_v45 = vld [vmem:[%s2517_s21 + $0x60] sm:$0xff]   ;;  %v2337_v46 = vld [vmem:[%s2517_s21 + $0x68] sm:$0xff]   ;;  %v2338_v47 = vld [vmem:[%s2517_s21 + $0x70] sm:$0xff]  }
  0x46   : > { %1996 = vmatmul.mubr.msk.bf16.gmra.mrb[8].mxu0 %vm340_vm1, %v2306_v13  ;;  %2048 = vmatmul.mubr.msk.bf16.gmra.mrb[8].mxu1 %vm340_vm1, %v2306_v13 }
  0x47   : > { %1999 = vmatprep.mubr.msk.bf16.mxu0 %vm340_vm1, %v2307_v14  ;;  %2051 = vmatprep.mubr.msk.bf16.mxu1 %vm340_vm1, %v2307_v14 }
  0x4e   : > { %2000 = vmatmul.mubr.msk.bf16.gmra.mrb[12].mxu0 %vm340_vm1, %v2308_v17  ;;  %2052 = vmatmul.mubr.msk.bf16.gmra.mrb[12].mxu1 %vm340_vm1, %v2308_v17 }
  0x4f   : > { %2003 = vmatprep.mubr.msk.bf16.mxu0 %vm340_vm1, %v2309_v18  ;;  %2055 = vmatprep.mubr.msk.bf16.mxu1 %vm340_vm1, %v2309_v18 }
  0x56   : > { %2004 = vmatmul.mubr.msk.bf16.gmra.mrb[16].mxu0 %vm340_vm1, %v2310_v19  ;;  %2056 = vmatmul.mubr.msk.bf16.gmra.mrb[16].mxu1 %vm340_vm1, %v2310_v19 }
  0x57   : > { %2007 = vmatprep.mubr.msk.bf16.mxu0 %vm340_vm1, %v2311_v20  ;;  %2059 = vmatprep.mubr.msk.bf16.mxu1 %vm340_vm1, %v2311_v20 }
  0x5e   : > { %2008 = vmatmul.mubr.msk.bf16.gmra.mrb[20].mxu0 %vm340_vm1, %v2312_v21  ;;  %2060 = vmatmul.mubr.msk.bf16.gmra.mrb[20].mxu1 %vm340_vm1, %v2312_v21 }
  0x5f   : > { %2013 = vmatprep.mubr.msk.bf16.mxu0 %vm340_vm1, %v2313_v22  ;;  %2065 = vmatprep.mubr.msk.bf16.mxu1 %vm340_vm1, %v2313_v22 }
  0x66   : > { %2014 = vmatmul.mubr.msk.bf16.vlgmr.msra.gmra.mrb[0].mxu0 %vm340_vm1, %v2314_v23  ;;  %2066 = vmatmul.mubr.msk.bf16.vlgmr.msra.gmra.mrb[0].mxu1 %vm340_vm1, %v2314_v23 }
  0x67   : > { %2090 = vmatpush3.bf16.msra.mxu0 %v1153_v24  ;;  %2116 = vmatpush3.bf16.msra.mxu1 %v1317_v26 }
  0x68   : > { %2017 = vmatprep.mubr.msk.bf16.mxu0 %vm340_vm1, %v2317_v25  ;;  %2069 = vmatprep.mubr.msk.bf16.mxu1 %vm340_vm1, %v2317_v25 }
  0x6e   : > { %2018 = vmatmul.mubr.msk.bf16.gmra.mrb[4].mxu0 %vm340_vm1, %v2318_v27  ;;  %2070 = vmatmul.mubr.msk.bf16.gmra.mrb[4].mxu1 %vm340_vm1, %v2318_v27 }
  0x6f   : > { %2021 = vmatprep.mubr.msk.bf16.mxu0 %vm340_vm1, %v2319_v28  ;;  %2073 = vmatprep.mubr.msk.bf16.mxu1 %vm340_vm1, %v2319_v28 }
  0x76   : > { %2022 = vmatmul.mubr.msk.bf16.gmra.mrb[8].mxu0 %vm340_vm1, %v2320_v29  ;;  %2074 = vmatmul.mubr.msk.bf16.gmra.mrb[8].mxu1 %vm340_vm1, %v2320_v29 }
  0x77   : > { %2025 = vmatprep.mubr.msk.bf16.mxu0 %vm340_vm1, %v2321_v30  ;;  %2077 = vmatprep.mubr.msk.bf16.mxu1 %vm340_vm1, %v2321_v30 }
  0x7e   : > { %2026 = vmatmul.mubr.msk.bf16.gmra.mrb[12].mxu0 %vm340_vm1, %v2322_v31  ;;  %2078 = vmatmul.mubr.msk.bf16.gmra.mrb[12].mxu1 %vm340_vm1, %v2322_v31 }
  0x7f   : > { %2029 = vmatprep.mubr.msk.bf16.mxu0 %vm340_vm1, %v2323_v32  ;;  %2081 = vmatprep.mubr.msk.bf16.mxu1 %vm340_vm1, %v2323_v32 }
  0x86   : > { %2030 = vmatmul.mubr.msk.bf16.gmra.mrb[16].mxu0 %vm340_vm1, %v2324_v33  ;;  %2082 = vmatmul.mubr.msk.bf16.gmra.mrb[16].mxu1 %vm340_vm1, %v2324_v33 }
  0x87   : > { %2033 = vmatprep.mubr.msk.bf16.mxu0 %vm340_vm1, %v2325_v34  ;;  %2085 = vmatprep.mubr.msk.bf16.mxu1 %vm340_vm1, %v2325_v34 }
  0x8e   : > { %2034 = vmatmul.mubr.msk.bf16.gmra.mrb[20].mxu0 %vm340_vm1, %v2326_v35  ;;  %2086 = vmatmul.mubr.msk.bf16.gmra.mrb[20].mxu1 %vm340_vm1, %v2326_v35 }
  0x8f   : > { %2091 = vmatprep.mubr.msk.bf16.mxu0 %vm340_vm1, %v2327_v36  ;;  %2117 = vmatprep.mubr.msk.bf16.mxu1 %vm340_vm1, %v2327_v36 }
  0x96   : > { %2092 = vmatmul.mubr.msk.bf16.vlgmr.msra.gmra.mrb[0].mxu0 %vm340_vm1, %v2328_v37  ;;  %2118 = vmatmul.mubr.msk.bf16.vlgmr.msra.gmra.mrb[0].mxu1 %vm340_vm1, %v2328_v37 }
  0x97   : > { %2095 = vmatprep.mubr.msk.bf16.mxu0 %vm340_vm1, %v2329_v38  ;;  %2121 = vmatprep.mubr.msk.bf16.mxu1 %vm340_vm1, %v2329_v38 }
  0x9e   : > { %2096 = vmatmul.mubr.msk.bf16.gmra.mrb[4].mxu0 %vm340_vm1, %v2330_v39  ;;  %2122 = vmatmul.mubr.msk.bf16.gmra.mrb[4].mxu1 %vm340_vm1, %v2330_v39 }
  0x9f   : > { %2099 = vmatprep.mubr.msk.bf16.mxu0 %vm340_vm1, %v2331_v40  ;;  %2125 = vmatprep.mubr.msk.bf16.mxu1 %vm340_vm1, %v2331_v40 }
  0xa6   : > { %2100 = vmatmul.mubr.msk.bf16.gmra.mrb[8].mxu0 %vm340_vm1, %v2332_v41  ;;  %2126 = vmatmul.mubr.msk.bf16.gmra.mrb[8].mxu1 %vm340_vm1, %v2332_v41 }
  0xa7   : > { %2103 = vmatprep.mubr.msk.bf16.mxu0 %vm340_vm1, %v2333_v42  ;;  %2129 = vmatprep.mubr.msk.bf16.mxu1 %vm340_vm1, %v2333_v42 }
  0xae   : > { %2104 = vmatmul.mubr.msk.bf16.gmra.mrb[12].mxu0 %vm340_vm1, %v2334_v43  ;;  %2130 = vmatmul.mubr.msk.bf16.gmra.mrb[12].mxu1 %vm340_vm1, %v2334_v43 }
  0xaf   : > { %2107 = vmatprep.mubr.msk.bf16.mxu0 %vm340_vm1, %v2335_v44  ;;  %2133 = vmatprep.mubr.msk.bf16.mxu1 %vm340_vm1, %v2335_v44 }
  0xb6   : > { %2108 = vmatmul.mubr.msk.bf16.gmra.mrb[16].mxu0 %vm340_vm1, %v2336_v45  ;;  %2134 = vmatmul.mubr.msk.bf16.gmra.mrb[16].mxu1 %vm340_vm1, %v2336_v45 }
  0xb7   : > { %2111 = vmatprep.mubr.msk.bf16.mxu0 %vm340_vm1, %v2337_v46  ;;  %2137 = vmatprep.mubr.msk.bf16.mxu1 %vm340_vm1, %v2337_v46 }
  0xbe   : > { %2112 = vmatmul.mubr.msk.bf16.gmra.mrb[20].mxu0 %vm340_vm1, %v2338_v47  ;;  %2138 = vmatmul.mubr.msk.bf16.gmra.mrb[20].mxu1 %vm340_vm1, %v2338_v47 }
 0x169   : > { %v2093_v49 = vpop.f32.mrb[0].mxu0  ;;  %v2119_v51 = vpop.f32.mrb[0].mxu1 }
 0x16a   : > { %v1480_v50 = vadd.f32 %v2093_v49, %v2656_v48  ;;  %v1189_v52 = vpop.f32.mrb[1].mxu0  ;;  %v1529_v53 = vadd.f32 %v2119_v51, %v2656_v48  ;;  %v1353_v55 = vpop.f32.mrb[1].mxu1 }
 0x16b   : > { %v1478_v54 = vadd.f32 %v2656_v48, %v1189_v52  ;;  %v2094_v56 = vpop.f32.mrb[2].mxu0  ;;  %v1527_v57 = vadd.f32 %v2656_v48, %v1353_v55  ;;  %v2120_v59 = vpop.f32.mrb[2].mxu1 }
 0x16c   : > { %1505 = vst.msk [vmem:[%s2661_s22 + $0x10] sm:$0xff] %vm1502_vm2, %v1480_v50  ;;  %v1481_v58 = vadd.f32 %v2094_v56, %v2656_v48  ;;  %v1192_v60 = vpop.f32.mrb[3].mxu0  ;;  %1882 = vst.msk [vmem:[%s2661_s22 + $0x28] sm:$0xff] %vm1502_vm2, %v1529_v53  ;;  %v1530_v61 = vadd.f32 %v2120_v59, %v2656_v48  ;;  %v1356_v63 = vpop.f32.mrb[3].mxu1 }
 0x16d   : > { %1503 = vst.msk [vmem:[%s2661_s22] sm:$0xff] %vm1502_vm2, %v1478_v54  ;;  %v1479_v62 = vadd.f32 %v2656_v48, %v1192_v60  ;;  %1880 = vst.msk [vmem:[%s2661_s22 + $0x18] sm:$0xff] %vm1502_vm2, %v1527_v57  ;;  %v1528_v0 = vadd.f32 %v2656_v48, %v1356_v63 }
 0x16e   : > { %1506 = vst.msk [vmem:[%s2661_s22 + $0x30] sm:$0xff] %vm1502_vm2, %v1481_v58  ;;  %1883 = vst.msk [vmem:[%s2661_s22 + $0x48] sm:$0xff] %vm1502_vm2, %v1530_v61 }
 0x16f   : > { %1504 = vst.msk [vmem:[%s2661_s22 + $0x8] sm:$0xff] %vm1502_vm2, %v1479_v62  ;;  %1881 = vst.msk [vmem:[%s2661_s22 + $0x20] sm:$0xff] %vm1502_vm2, %v1528_v0 }
 0x171   : > { %v2097_v1 = vpop.f32.mrb[4].mxu0  ;;  %v2123_v3 = vpop.f32.mrb[4].mxu1 }
 0x172   : > { %v1484_v2 = vadd.f32 %v2097_v1, %v2656_v48  ;;  %v1205_v4 = vpop.f32.mrb[5].mxu0  ;;  %v1533_v5 = vadd.f32 %v2123_v3, %v2656_v48  ;;  %v1369_v7 = vpop.f32.mrb[5].mxu1 }
 0x173   : > { %v1482_v6 = vadd.f32 %v2656_v48, %v1205_v4  ;;  %v2098_v8 = vpop.f32.mrb[6].mxu0  ;;  %v1531_v9 = vadd.f32 %v2656_v48, %v1369_v7  ;;  %v2124_v11 = vpop.f32.mrb[6].mxu1 }
 0x174   : > { %1509 = vst.msk [vmem:[%s2661_s22 + $0x60] sm:$0xff] %vm1502_vm2, %v1484_v2  ;;  %v1485_v10 = vadd.f32 %v2098_v8, %v2656_v48  ;;  %v1208_v12 = vpop.f32.mrb[7].mxu0  ;;  %1886 = vst.msk [vmem:[%s2661_s22 + $0x78] sm:$0xff] %vm1502_vm2, %v1533_v5  ;;  %v1534_v13 = vadd.f32 %v2124_v11, %v2656_v48  ;;  %v1372_v15 = vpop.f32.mrb[7].mxu1 }
 0x175   : > { %1507 = vst.msk [vmem:[%s2661_s22 + $0x38] sm:$0xff] %vm1502_vm2, %v1482_v6  ;;  %v1483_v14 = vadd.f32 %v2656_v48, %v1208_v12  ;;  %1884 = vst.msk [vmem:[%s2661_s22 + $0x50] sm:$0xff] %vm1502_vm2, %v1531_v9  ;;  %v1532_v16 = vadd.f32 %v2656_v48, %v1372_v15 }
 0x176   : > { %1510 = vst.msk [vmem:[%s2661_s22 + $0x68] sm:$0xff] %vm1502_vm2, %v1485_v10  ;;  %1887 = vst.msk [vmem:[%s2661_s22 + $0x80] sm:$0xff] %vm1502_vm2, %v1534_v13 }
 0x177   : > { %1508 = vst.msk [vmem:[%s2661_s22 + $0x40] sm:$0xff] %vm1502_vm2, %v1483_v14  ;;  %1885 = vst.msk [vmem:[%s2661_s22 + $0x58] sm:$0xff] %vm1502_vm2, %v1532_v16 }
 0x179   : > { %v2101_v17 = vpop.f32.mrb[8].mxu0  ;;  %v2127_v19 = vpop.f32.mrb[8].mxu1 }
 0x17a   : > { %v1488_v18 = vadd.f32 %v2101_v17, %v2656_v48  ;;  %v1221_v20 = vpop.f32.mrb[9].mxu0  ;;  %v1537_v21 = vadd.f32 %v2127_v19, %v2656_v48  ;;  %v1385_v23 = vpop.f32.mrb[9].mxu1 }
 0x17b   : > { %v1486_v22 = vadd.f32 %v2656_v48, %v1221_v20  ;;  %v2102_v24 = vpop.f32.mrb[10].mxu0  ;;  %v1535_v25 = vadd.f32 %v2656_v48, %v1385_v23  ;;  %v2128_v27 = vpop.f32.mrb[10].mxu1 }
 0x17c   : > { %1513 = vst.msk [vmem:[%s2661_s22 + $0x98] sm:$0xff] %vm1502_vm2, %v1488_v18  ;;  %v1489_v26 = vadd.f32 %v2102_v24, %v2656_v48  ;;  %v1224_v28 = vpop.f32.mrb[11].mxu0  ;;  %1890 = vst.msk [vmem:[%s2661_s22 + $0xb0] sm:$0xff] %vm1502_vm2, %v1537_v21  ;;  %v1538_v29 = vadd.f32 %v2128_v27, %v2656_v48  ;;  %v1388_v31 = vpop.f32.mrb[11].mxu1 }
 0x17d   : > { %1511 = vst.msk [vmem:[%s2661_s22 + $0x70] sm:$0xff] %vm1502_vm2, %v1486_v22  ;;  %v1487_v30 = vadd.f32 %v2656_v48, %v1224_v28  ;;  %1888 = vst.msk [vmem:[%s2661_s22 + $0x88] sm:$0xff] %vm1502_vm2, %v1535_v25  ;;  %v1536_v32 = vadd.f32 %v2656_v48, %v1388_v31 }
 0x17e   : > { %1514 = vst.msk [vmem:[%s2661_s22 + $0xa0] sm:$0xff] %vm1502_vm2, %v1489_v26  ;;  %1891 = vst.msk [vmem:[%s2661_s22 + $0xb8] sm:$0xff] %vm1502_vm2, %v1538_v29 }
 0x17f   : > { %1512 = vst.msk [vmem:[%s2661_s22 + $0x90] sm:$0xff] %vm1502_vm2, %v1487_v30  ;;  %1889 = vst.msk [vmem:[%s2661_s22 + $0xa8] sm:$0xff] %vm1502_vm2, %v1536_v32 }
 0x181   : > { %v2105_v33 = vpop.f32.mrb[12].mxu0  ;;  %v2131_v35 = vpop.f32.mrb[12].mxu1 }
 0x182   : > { %v1492_v34 = vadd.f32 %v2105_v33, %v2656_v48  ;;  %v1237_v36 = vpop.f32.mrb[13].mxu0  ;;  %v1541_v37 = vadd.f32 %v2131_v35, %v2656_v48  ;;  %v1401_v39 = vpop.f32.mrb[13].mxu1 }
 0x183   : > { %v1490_v38 = vadd.f32 %v2656_v48, %v1237_v36  ;;  %v2106_v40 = vpop.f32.mrb[14].mxu0  ;;  %v1539_v41 = vadd.f32 %v2656_v48, %v1401_v39  ;;  %v2132_v43 = vpop.f32.mrb[14].mxu1 }
 0x184   : > { %1517 = vst.msk [vmem:[%s2661_s22 + $0xd0] sm:$0xff] %vm1502_vm2, %v1492_v34  ;;  %v1493_v42 = vadd.f32 %v2106_v40, %v2656_v48  ;;  %v1240_v44 = vpop.f32.mrb[15].mxu0  ;;  %1894 = vst.msk [vmem:[%s2661_s22 + $0xe8] sm:$0xff] %vm1502_vm2, %v1541_v37  ;;  %v1542_v45 = vadd.f32 %v2132_v43, %v2656_v48  ;;  %v1404_v47 = vpop.f32.mrb[15].mxu1 }
 0x185   : > { %1515 = vst.msk [vmem:[%s2661_s22 + $0xc0] sm:$0xff] %vm1502_vm2, %v1490_v38  ;;  %v1491_v46 = vadd.f32 %v2656_v48, %v1240_v44  ;;  %1892 = vst.msk [vmem:[%s2661_s22 + $0xd8] sm:$0xff] %vm1502_vm2, %v1539_v41  ;;  %v1540_v49 = vadd.f32 %v2656_v48, %v1404_v47 }
 0x186   : > { %1518 = vst.msk [vmem:[%s2661_s22 + $0xf0] sm:$0xff] %vm1502_vm2, %v1493_v42  ;;  %1895 = vst.msk [vmem:[%s2661_s22 + $0x108] sm:$0xff] %vm1502_vm2, %v1542_v45 }
 0x187   : > { %1516 = vst.msk [vmem:[%s2661_s22 + $0xc8] sm:$0xff] %vm1502_vm2, %v1491_v46  ;;  %1893 = vst.msk [vmem:[%s2661_s22 + $0xe0] sm:$0xff] %vm1502_vm2, %v1540_v49 }
 0x189   : > { %v2109_v50 = vpop.f32.mrb[16].mxu0  ;;  %v2135_v52 = vpop.f32.mrb[16].mxu1 }
 0x18a   : > { %v1496_v51 = vadd.f32 %v2109_v50, %v2656_v48  ;;  %v1253_v53 = vpop.f32.mrb[17].mxu0  ;;  %v1545_v54 = vadd.f32 %v2135_v52, %v2656_v48  ;;  %v1417_v56 = vpop.f32.mrb[17].mxu1 }
 0x18b   : > { %v1494_v55 = vadd.f32 %v2656_v48, %v1253_v53  ;;  %v2110_v57 = vpop.f32.mrb[18].mxu0  ;;  %v1543_v58 = vadd.f32 %v2656_v48, %v1417_v56  ;;  %v2136_v60 = vpop.f32.mrb[18].mxu1 }
 0x18c   : > { %1521 = vst.msk [vmem:[%s2661_s22 + $0x120] sm:$0xff] %vm1502_vm2, %v1496_v51  ;;  %v1497_v59 = vadd.f32 %v2110_v57, %v2656_v48  ;;  %v1256_v61 = vpop.f32.mrb[19].mxu0  ;;  %1898 = vst.msk [vmem:[%s2661_s22 + $0x138] sm:$0xff] %vm1502_vm2, %v1545_v54  ;;  %v1546_v62 = vadd.f32 %v2136_v60, %v2656_v48  ;;  %v1420_v0 = vpop.f32.mrb[19].mxu1 }
 0x18d   : > { %1519 = vst.msk [vmem:[%s2661_s22 + $0xf8] sm:$0xff] %vm1502_vm2, %v1494_v55  ;;  %v1495_v63 = vadd.f32 %v2656_v48, %v1256_v61  ;;  %1896 = vst.msk [vmem:[%s2661_s22 + $0x110] sm:$0xff] %vm1502_vm2, %v1543_v58  ;;  %v1544_v1 = vadd.f32 %v2656_v48, %v1420_v0 }
 0x18e   : > { %1522 = vst.msk [vmem:[%s2661_s22 + $0x128] sm:$0xff] %vm1502_vm2, %v1497_v59  ;;  %1899 = vst.msk [vmem:[%s2661_s22 + $0x140] sm:$0xff] %vm1502_vm2, %v1546_v62 }
 0x18f   : > { %1520 = vst.msk [vmem:[%s2661_s22 + $0x100] sm:$0xff] %vm1502_vm2, %v1495_v63  ;;  %1897 = vst.msk [vmem:[%s2661_s22 + $0x118] sm:$0xff] %vm1502_vm2, %v1544_v1 }
 0x191   : > { %v2113_v2 = vpop.f32.mrb[20].mxu0  ;;  %v2139_v4 = vpop.f32.mrb[20].mxu1 }
 0x192   : > { %v1500_v3 = vadd.f32 %v2113_v2, %v2656_v48  ;;  %v1269_v5 = vpop.f32.mrb[21].mxu0  ;;  %v1549_v6 = vadd.f32 %v2139_v4, %v2656_v48  ;;  %v1433_v8 = vpop.f32.mrb[21].mxu1 }
 0x193   : > { %v1498_v7 = vadd.f32 %v2656_v48, %v1269_v5  ;;  %v2114_v9 = vpop.f32.mrb[22].mxu0  ;;  %v1547_v10 = vadd.f32 %v2656_v48, %v1433_v8  ;;  %v2140_v12 = vpop.f32.mrb[22].mxu1 }
 0x194   : > { %1525 = vst.msk [vmem:[%s2661_s22 + $0x158] sm:$0xff] %vm1502_vm2, %v1500_v3  ;;  %v1501_v11 = vadd.f32 %v2114_v9, %v2656_v48  ;;  %v1272_v13 = vpop.f32.mrb[23].mxu0  ;;  %1902 = vst.msk [vmem:[%s2661_s22 + $0x170] sm:$0xff] %vm1502_vm2, %v1549_v6  ;;  %v1550_v14 = vadd.f32 %v2140_v12, %v2656_v48  ;;  %v1436_v16 = vpop.f32.mrb[23].mxu1 }
 0x195   : > { %1523 = vst.msk [vmem:[%s2661_s22 + $0x130] sm:$0xff] %vm1502_vm2, %v1498_v7  ;;  %v1499_v15 = vadd.f32 %v2656_v48, %v1272_v13  ;;  %1900 = vst.msk [vmem:[%s2661_s22 + $0x148] sm:$0xff] %vm1502_vm2, %v1547_v10  ;;  %v1548_v17 = vadd.f32 %v2656_v48, %v1436_v16 }
 0x196   : > { %1526 = vst.msk [vmem:[%s2661_s22 + $0x160] sm:$0xff] %vm1502_vm2, %v1501_v11  ;;  %1903 = vst.msk [vmem:[%s2661_s22 + $0x178] sm:$0xff] %vm1502_vm2, %v1550_v14 }
 0x197   : > { %1524 = vst.msk [vmem:[%s2661_s22 + $0x150] sm:$0xff] %vm1502_vm2, %v1499_v15  ;;  %1901 = vst.msk [vmem:[%s2661_s22 + $0x168] sm:$0xff] %vm1502_vm2, %v1548_v17 }
 0x198 PF: > { %s14_s16 = sadd.s32 1, %s2409_s16   ;;  %s2834_s12 = smov %s2401_s14 }
 0x199   : > { %p11_p7 = scmp.ge.s32.totalorder %s14_s16, 8   ;;  %s2835_s13 = smov %s2405_s15 }
 0x19a   : > { %s2836_s14 = smov %s2839_s18  ;;  %s2837_s15 = smov %s2843_s19 }
 0x19b   :  { %13 = sbr.rel (!%p11_p7) target bundleno = 3 (0x3), region = 76 }
 0x1a2   :  { %1608 = vsyncpa [#allocation3], 1 }
 0x1a3   :  { %1610 = vsyncpa [#allocation3 + $0x1], 1 }

// kernel: tpu_custom_call.1
= control target key start
LH: loop header
LB: loop body
LE: loop exit
PB: predicated region body
PF: predicated region fallthrough
CT: control target
= control target key end

     0   :  { %8 = vsyncpa [#allocation3], 0  ;;  %s2430_s12 = smov 0   ;;  %s2432_s13 = smov 0   ;;  %s2820_s0 = inlined_call_operand.vmem [shape: bf16[2,26,24,12], index: 0, kind: input, shape index: {}]   ;;  %s2821_s1 = inlined_call_operand.vmem [shape: bf16[2,3,12,8], index: 1, kind: input, shape index: {}]   ;;  %s2822_s2 = inlined_call_operand.hbm [shape: f32[1,8], index: 2, kind: input, shape index: {}]   ;;  %s2823_s3 = inlined_call_operand.vmem [shape: f32[2,24,2,24,8], index: 3, kind: output, shape index: {}]  }
   0x1   :  { %s2434_s14 = smov 0   ;;  %s2436_s15 = smov 0  }
   0x2   :  { %s2438_s16 = smov 0  }
   0x3 LB: > { %s1688_s17 = sadd.s32 4294967295, %s2407_s16   ;;  %s23_s18 = sadd.s32 1, %s2399_s14  ;;  %s2407_s16 = sphi %s2438_s16, %s14_s16   ;;  %s2403_s15 = sphi %s2436_s15, %s2835_s15   ;;  %s2399_s14 = sphi %s2434_s14, %s2834_s14   ;;  %s2395_s13 = sphi %s2432_s13, %s2833_s13   ;;  %s2391_s12 = sphi %s2430_s12, %s2832_s12  }
   0x4   : > { %p24_p0 = scmp.ge.s32.totalorder %s23_s18, 3  ;;  %s26_s19 = sadd.s32 1, %s2403_s15 }
   0x5   : > { %p1690_p1 = scmp.ge.s32.totalorder %s2407_s16, 1  ;;  %p127_p2 = scmp.lt.s32.totalorder %s2407_s16, 7 }
   0x6   : > { %s2837_s18 = smov (%p24_p0, %s23_s18), 0  ;;  %s2839_s19 = smov (!%p24_p0, %s26_s19), %s2403_s15 }
   0x7   : > { %p2463_p3 = pnand %p1690_p1, %p127_p2  ;;  %p28_p4 = scmp.ge.s32.totalorder %s2839_s19, 2 }
   0x8   : > { %p2467_p5 = scmp.eq.s32.totalorder %s1688_s17, 0  ;;  %s2409_s22 = smov [#allocation2]  }
   0x9   : > { %s2827_s20 = scalar_select %p2463_p3, 1, 0 }
   0xa   : > { %s2828_s21 = scalar_select %p2467_p5, 1, 0 }
   0xb   : > { %p2248_p6 = pneg %p2463_p3  ;;  %s2841_s19 = smov (%p28_p4, %s2839_s19), 0 }
   0xc   : > { %s143_s23 = sshll.u32 %s2409_s22, 4  ;;  %s2337_s27 = scalar_lea.hbm %s2822_s2, 16  ;;  %s144_s23 = int_to_ptr.vmem [resolvable:$true] %s143_s23 }
   0xd   : > { %p2477_p7 = pnand %p2467_p5, %p2248_p6  ;;  %p2338_p8 = scmp.ne.s32.totalorder %s2822_s2, %s2337_s27 }
   0xe   : > { %p2344_p12 = scmp.lt.u32.totalorder %s2337_s27, %s2822_s2 }
   0xf   : > { %p2339_p9 = pneg %p2477_p7 }
  0x11   : > { %p2340_p10 = pnand %p2339_p9, %p2338_p8 }
  0x13   : > { %p2341_p11 = pneg %p2340_p10 }
  0x15   : > { %p2346_p13 = pnand %p2344_p12, %p2341_p11 }
  0x17   : > { %2349 = shalt.err (!%p2346_p13)
}
  0x18   : > { %s2350_s5 = scalar_lea.vmem %s144_s23, 16  ;;  %s2357_s6 = scalar_lea.vmem %s144_s23, 32 }
  0x19   : > { %p2351_p0 = scmp.ne.s32.totalorder %s144_s23, %s2350_s5  ;;  %p2358_p4 = scmp.lt.s32.totalorder %s144_s23, %s144_s23 }
  0x1a   : > { %p2359_p6 = scmp.lt.s32.totalorder %s2357_s6, %s2350_s5 }
  0x1b   : > { %p2353_p1 = pnand %p2351_p0, %p2339_p9 }
  0x1c   : > { %p2360_p5 = por %p2359_p6, %p2358_p4 }
  0x1d   : > { %p2354_p2 = pneg %p2353_p1 }
  0x1f   : > { %p2361_p3 = pnand %p2360_p5, %p2354_p2 }
  0x21   : > { %2364 = shalt.err (!%p2361_p3)
}
  0x22   : > { %2251 = dma.hbm_to_vmem [thread:$0]  (!%p2477_p7), %s2822_s2, 16, %s144_s23, [#allocation3]  }
  0x23   : > { %p2830_p8 = scmp.ne.s32.totalorder %s2827_s20, 0 }
  0x24   : > { %p2831_p10 = scmp.ne.s32.totalorder (!%p2830_p8), %s2828_s21, 0 }
  0x25   : > { %164 = sbr.rel (%p2830_p8) target bundleno = 408 (0x198), region = 32 }
  0x2c   : > { %2386 = dma.done.wait (%p2831_p10), [#allocation3], 16  }
  0x2d   : > { %2388 = vsyncadd (%p2831_p10), [#allocation3], 4294967280  ;;  %p193_p5 = scmp.lt.s32.totalorder %s2395_s13, 1  ;;  %s1904_s9 = smul.u32 96, %s2391_s12  ;;  %vm377_vm0 = vcmask 1045504   ;;  %vm340_vm1 = vcmask 97280  }
  0x2e   : > { %v2295_v0 = vld [vmem:[%s2821_s1 + $0x8] sm:$0x3f]   ;;  %v2296_v1 = vld [vmem:[%s2821_s1 + $0x20] sm:$0x3f]   ;;  %v2300_v7 = vld [vmem:[%s2821_s1 + $0x18] sm:$0x3f]  }
  0x2f   : > { %s2843_s13 = smov (!%p193_p5, %s2395_s13), 1  ;;  %2235 = vmatprep.subr.msk.bf16.mxu0 %vm377_vm0, %v2295_v0  ;;  %v379_v2 = vsel %vm377_vm0, %v2295_v0, 0  ;;  %2237 = vmatprep.subr.msk.bf16.mxu1 %vm377_vm0, %v2296_v1  ;;  %v752_v4 = vsel %vm377_vm0, %v2296_v1, 0  ;;  %v2299_v6 = vld [vmem:[%s2821_s1] sm:$0x3f]   ;;  %v889_v10 = vsel %vm377_vm0, %v2300_v7, 0 }
  0x30   : > { %s2241_s10 = smul.u32 312, %s2843_s13  ;;  %1984 = vmatpush3.bf16.msra.mxu0 %v379_v2  ;;  %2036 = vmatpush3.bf16.msra.mxu1 %v752_v4  ;;  %v612_v8 = vsel %vm377_vm0, %v2299_v6, 0  ;;  %v2313_v15 = vld [vmem:[%s2821_s1 + $0x10] sm:$0x3f]   ;;  %v2314_v16 = vld [vmem:[%s2821_s1 + $0x28] sm:$0x3f]  }
  0x31   : > { %2236 = vmatprep.subr.msk.bf16.mxu0 %vm377_vm0, %v2299_v6  ;;  %2238 = vmatprep.subr.msk.bf16.mxu1 %vm377_vm0, %v2300_v7  ;;  %v1153_v24 = vsel %vm377_vm0, %v2313_v15, 0  ;;  %v1317_v26 = vsel %vm377_vm0, %v2314_v16, 0  ;;  %s1696_s7 = sshll.u32 %s2391_s12, 3  ;;  %s2243_s8 = smul.u32 144, %s2843_s13  ;;  %v2654_v48 = vld [vmem:[#allocation2] ss:$0 sm:$0xff] }
  0x32   : > { %s197_s20 = scalar_lea.vmem %s2820_s0, %s2241_s10  ;;  %p201_p3 = scmp.lt.s32.totalorder %s1696_s7, 23  ;;  %vm1502_vm2 = vcmask 64512  }
  0x33   : > { %s2515_s21 = scalar_lea.vmem %s197_s20, %s1904_s9 }
  0x34   : > { %v2297_v3 = vld [vmem:[%s2515_s21 + $0xc] sm:$0xff]   ;;  %v2298_v5 = vld [vmem:[%s2515_s21 + $0x14] sm:$0xff]   ;;  %v2301_v9 = vld [vmem:[%s2515_s21 + $0x1c] sm:$0xff]   ;;  %s2845_s7 = smov (!%p201_p3, %s1696_s7), 23 }
  0x35   : > { %1985 = vmatprep.mubr.msk.bf16.mxu0 %vm340_vm1, %v2297_v3  ;;  %2037 = vmatprep.mubr.msk.bf16.mxu1 %vm340_vm1, %v2297_v3  ;;  %v2302_v11 = vld [vmem:[%s2515_s21 + $0x24] sm:$0xff]   ;;  %v2303_v12 = vld [vmem:[%s2515_s21 + $0x2c] sm:$0xff]   ;;  %v2304_v13 = vld [vmem:[%s2515_s21 + $0x34] sm:$0xff]   ;;  %s2242_s9 = smul.u32 6, %s2845_s7 }
  0x36   : > { %1986 = vmatmul.mubr.msk.bf16.vlgmr.msra.gmra.mrb[0].mxu0 %vm340_vm1, %v2298_v5  ;;  %2038 = vmatmul.mubr.msk.bf16.vlgmr.msra.gmra.mrb[0].mxu1 %vm340_vm1, %v2298_v5  ;;  %v2305_v14 = vld [vmem:[%s2515_s21 + $0x3c] sm:$0xff]   ;;  %v2306_v17 = vld [vmem:[%s2515_s21 + $0x44] sm:$0xff]   ;;  %v2307_v18 = vld [vmem:[%s2515_s21 + $0x4c] sm:$0xff]  }
  0x37   : > { %2010 = vmatpush3.bf16.msra.mxu0 %v612_v8  ;;  %2062 = vmatpush3.bf16.msra.mxu1 %v889_v10  ;;  %v2308_v19 = vld [vmem:[%s2515_s21 + $0x54] sm:$0xff]   ;;  %v2309_v20 = vld [vmem:[%s2515_s21 + $0x5c] sm:$0xff]   ;;  %v2310_v21 = vld [vmem:[%s2515_s21 + $0x64] sm:$0xff]   ;;  %s205_s10 = sadd.s32 %s2243_s8, %s2242_s9 }
  0x38   : > { %1989 = vmatprep.mubr.msk.bf16.mxu0 %vm340_vm1, %v2301_v9  ;;  %2041 = vmatprep.mubr.msk.bf16.mxu1 %vm340_vm1, %v2301_v9  ;;  %v2311_v22 = vld [vmem:[%s2515_s21] sm:$0xff]   ;;  %v2312_v23 = vld [vmem:[%s2515_s21 + $0x8] sm:$0xff]   ;;  %v2315_v25 = vld [vmem:[%s2515_s21 + $0x10] sm:$0xff]   ;;  %s1697_s11 = sshll.u32 %s205_s10, 3 }
  0x39   : > { %2239 = vmatprep.subr.msk.bf16.mxu0 %vm377_vm0, %v2313_v15  ;;  %2240 = vmatprep.subr.msk.bf16.mxu1 %vm377_vm0, %v2314_v16  ;;  %v2316_v27 = vld [vmem:[%s2515_s21 + $0x18] sm:$0xff]   ;;  %v2317_v28 = vld [vmem:[%s2515_s21 + $0x20] sm:$0xff]   ;;  %v2318_v29 = vld [vmem:[%s2515_s21 + $0x28] sm:$0xff]   ;;  %s2659_s22 = scalar_lea.vmem %s2823_s3, %s1697_s11 }
  0x3a   : > { %v2319_v30 = vld [vmem:[%s2515_s21 + $0x30] sm:$0xff]   ;;  %v2320_v31 = vld [vmem:[%s2515_s21 + $0x38] sm:$0xff]   ;;  %v2321_v32 = vld [vmem:[%s2515_s21 + $0x40] sm:$0xff]  }
  0x3b   : > { %v2322_v33 = vld [vmem:[%s2515_s21 + $0x48] sm:$0xff]   ;;  %v2323_v34 = vld [vmem:[%s2515_s21 + $0x50] sm:$0xff]   ;;  %v2324_v35 = vld [vmem:[%s2515_s21 + $0x58] sm:$0xff]  }
  0x3c   : > { %v2325_v36 = vld [vmem:[%s2515_s21 + $0x18] sm:$0xff]   ;;  %v2326_v37 = vld [vmem:[%s2515_s21 + $0x20] sm:$0xff]   ;;  %v2327_v38 = vld [vmem:[%s2515_s21 + $0x28] sm:$0xff]  }
  0x3d   : > { %v2328_v39 = vld [vmem:[%s2515_s21 + $0x30] sm:$0xff]   ;;  %v2329_v40 = vld [vmem:[%s2515_s21 + $0x38] sm:$0xff]   ;;  %v2330_v41 = vld [vmem:[%s2515_s21 + $0x40] sm:$0xff]  }
  0x3e   : > { %1990 = vmatmul.mubr.msk.bf16.gmra.mrb[4].mxu0 %vm340_vm1, %v2302_v11  ;;  %2042 = vmatmul.mubr.msk.bf16.gmra.mrb[4].mxu1 %vm340_vm1, %v2302_v11  ;;  %v2331_v42 = vld [vmem:[%s2515_s21 + $0x48] sm:$0xff]   ;;  %v2332_v43 = vld [vmem:[%s2515_s21 + $0x50] sm:$0xff]   ;;  %v2333_v44 = vld [vmem:[%s2515_s21 + $0x58] sm:$0xff]  }
  0x3f   : > { %1993 = vmatprep.mubr.msk.bf16.mxu0 %vm340_vm1, %v2303_v12  ;;  %2045 = vmatprep.mubr.msk.bf16.mxu1 %vm340_vm1, %v2303_v12  ;;  %v2334_v45 = vld [vmem:[%s2515_s21 + $0x60] sm:$0xff]   ;;  %v2335_v46 = vld [vmem:[%s2515_s21 + $0x68] sm:$0xff]   ;;  %v2336_v47 = vld [vmem:[%s2515_s21 + $0x70] sm:$0xff]  }
  0x46   : > { %1994 = vmatmul.mubr.msk.bf16.gmra.mrb[8].mxu0 %vm340_vm1, %v2304_v13  ;;  %2046 = vmatmul.mubr.msk.bf16.gmra.mrb[8].mxu1 %vm340_vm1, %v2304_v13 }
  0x47   : > { %1997 = vmatprep.mubr.msk.bf16.mxu0 %vm340_vm1, %v2305_v14  ;;  %2049 = vmatprep.mubr.msk.bf16.mxu1 %vm340_vm1, %v2305_v14 }
  0x4e   : > { %1998 = vmatmul.mubr.msk.bf16.gmra.mrb[12].mxu0 %vm340_vm1, %v2306_v17  ;;  %2050 = vmatmul.mubr.msk.bf16.gmra.mrb[12].mxu1 %vm340_vm1, %v2306_v17 }
  0x4f   : > { %2001 = vmatprep.mubr.msk.bf16.mxu0 %vm340_vm1, %v2307_v18  ;;  %2053 = vmatprep.mubr.msk.bf16.mxu1 %vm340_vm1, %v2307_v18 }
  0x56   : > { %2002 = vmatmul.mubr.msk.bf16.gmra.mrb[16].mxu0 %vm340_vm1, %v2308_v19  ;;  %2054 = vmatmul.mubr.msk.bf16.gmra.mrb[16].mxu1 %vm340_vm1, %v2308_v19 }
  0x57   : > { %2005 = vmatprep.mubr.msk.bf16.mxu0 %vm340_vm1, %v2309_v20  ;;  %2057 = vmatprep.mubr.msk.bf16.mxu1 %vm340_vm1, %v2309_v20 }
  0x5e   : > { %2006 = vmatmul.mubr.msk.bf16.gmra.mrb[20].mxu0 %vm340_vm1, %v2310_v21  ;;  %2058 = vmatmul.mubr.msk.bf16.gmra.mrb[20].mxu1 %vm340_vm1, %v2310_v21 }
  0x5f   : > { %2011 = vmatprep.mubr.msk.bf16.mxu0 %vm340_vm1, %v2311_v22  ;;  %2063 = vmatprep.mubr.msk.bf16.mxu1 %vm340_vm1, %v2311_v22 }
  0x66   : > { %2012 = vmatmul.mubr.msk.bf16.vlgmr.msra.gmra.mrb[0].mxu0 %vm340_vm1, %v2312_v23  ;;  %2064 = vmatmul.mubr.msk.bf16.vlgmr.msra.gmra.mrb[0].mxu1 %vm340_vm1, %v2312_v23 }
  0x67   : > { %2088 = vmatpush3.bf16.msra.mxu0 %v1153_v24  ;;  %2114 = vmatpush3.bf16.msra.mxu1 %v1317_v26 }
  0x68   : > { %2015 = vmatprep.mubr.msk.bf16.mxu0 %vm340_vm1, %v2315_v25  ;;  %2067 = vmatprep.mubr.msk.bf16.mxu1 %vm340_vm1, %v2315_v25 }
  0x6e   : > { %2016 = vmatmul.mubr.msk.bf16.gmra.mrb[4].mxu0 %vm340_vm1, %v2316_v27  ;;  %2068 = vmatmul.mubr.msk.bf16.gmra.mrb[4].mxu1 %vm340_vm1, %v2316_v27 }
  0x6f   : > { %2019 = vmatprep.mubr.msk.bf16.mxu0 %vm340_vm1, %v2317_v28  ;;  %2071 = vmatprep.mubr.msk.bf16.mxu1 %vm340_vm1, %v2317_v28 }
  0x76   : > { %2020 = vmatmul.mubr.msk.bf16.gmra.mrb[8].mxu0 %vm340_vm1, %v2318_v29  ;;  %2072 = vmatmul.mubr.msk.bf16.gmra.mrb[8].mxu1 %vm340_vm1, %v2318_v29 }
  0x77   : > { %2023 = vmatprep.mubr.msk.bf16.mxu0 %vm340_vm1, %v2319_v30  ;;  %2075 = vmatprep.mubr.msk.bf16.mxu1 %vm340_vm1, %v2319_v30 }
  0x7e   : > { %2024 = vmatmul.mubr.msk.bf16.gmra.mrb[12].mxu0 %vm340_vm1, %v2320_v31  ;;  %2076 = vmatmul.mubr.msk.bf16.gmra.mrb[12].mxu1 %vm340_vm1, %v2320_v31 }
  0x7f   : > { %2027 = vmatprep.mubr.msk.bf16.mxu0 %vm340_vm1, %v2321_v32  ;;  %2079 = vmatprep.mubr.msk.bf16.mxu1 %vm340_vm1, %v2321_v32 }
  0x86   : > { %2028 = vmatmul.mubr.msk.bf16.gmra.mrb[16].mxu0 %vm340_vm1, %v2322_v33  ;;  %2080 = vmatmul.mubr.msk.bf16.gmra.mrb[16].mxu1 %vm340_vm1, %v2322_v33 }
  0x87   : > { %2031 = vmatprep.mubr.msk.bf16.mxu0 %vm340_vm1, %v2323_v34  ;;  %2083 = vmatprep.mubr.msk.bf16.mxu1 %vm340_vm1, %v2323_v34 }
  0x8e   : > { %2032 = vmatmul.mubr.msk.bf16.gmra.mrb[20].mxu0 %vm340_vm1, %v2324_v35  ;;  %2084 = vmatmul.mubr.msk.bf16.gmra.mrb[20].mxu1 %vm340_vm1, %v2324_v35 }
  0x8f   : > { %2089 = vmatprep.mubr.msk.bf16.mxu0 %vm340_vm1, %v2325_v36  ;;  %2115 = vmatprep.mubr.msk.bf16.mxu1 %vm340_vm1, %v2325_v36 }
  0x96   : > { %2090 = vmatmul.mubr.msk.bf16.vlgmr.msra.gmra.mrb[0].mxu0 %vm340_vm1, %v2326_v37  ;;  %2116 = vmatmul.mubr.msk.bf16.vlgmr.msra.gmra.mrb[0].mxu1 %vm340_vm1, %v2326_v37 }
  0x97   : > { %2093 = vmatprep.mubr.msk.bf16.mxu0 %vm340_vm1, %v2327_v38  ;;  %2119 = vmatprep.mubr.msk.bf16.mxu1 %vm340_vm1, %v2327_v38 }
  0x9e   : > { %2094 = vmatmul.mubr.msk.bf16.gmra.mrb[4].mxu0 %vm340_vm1, %v2328_v39  ;;  %2120 = vmatmul.mubr.msk.bf16.gmra.mrb[4].mxu1 %vm340_vm1, %v2328_v39 }
  0x9f   : > { %2097 = vmatprep.mubr.msk.bf16.mxu0 %vm340_vm1, %v2329_v40  ;;  %2123 = vmatprep.mubr.msk.bf16.mxu1 %vm340_vm1, %v2329_v40 }
  0xa6   : > { %2098 = vmatmul.mubr.msk.bf16.gmra.mrb[8].mxu0 %vm340_vm1, %v2330_v41  ;;  %2124 = vmatmul.mubr.msk.bf16.gmra.mrb[8].mxu1 %vm340_vm1, %v2330_v41 }
  0xa7   : > { %2101 = vmatprep.mubr.msk.bf16.mxu0 %vm340_vm1, %v2331_v42  ;;  %2127 = vmatprep.mubr.msk.bf16.mxu1 %vm340_vm1, %v2331_v42 }
  0xae   : > { %2102 = vmatmul.mubr.msk.bf16.gmra.mrb[12].mxu0 %vm340_vm1, %v2332_v43  ;;  %2128 = vmatmul.mubr.msk.bf16.gmra.mrb[12].mxu1 %vm340_vm1, %v2332_v43 }
  0xaf   : > { %2105 = vmatprep.mubr.msk.bf16.mxu0 %vm340_vm1, %v2333_v44  ;;  %2131 = vmatprep.mubr.msk.bf16.mxu1 %vm340_vm1, %v2333_v44 }
  0xb6   : > { %2106 = vmatmul.mubr.msk.bf16.gmra.mrb[16].mxu0 %vm340_vm1, %v2334_v45  ;;  %2132 = vmatmul.mubr.msk.bf16.gmra.mrb[16].mxu1 %vm340_vm1, %v2334_v45 }
  0xb7   : > { %2109 = vmatprep.mubr.msk.bf16.mxu0 %vm340_vm1, %v2335_v46  ;;  %2135 = vmatprep.mubr.msk.bf16.mxu1 %vm340_vm1, %v2335_v46 }
  0xbe   : > { %2110 = vmatmul.mubr.msk.bf16.gmra.mrb[20].mxu0 %vm340_vm1, %v2336_v47  ;;  %2136 = vmatmul.mubr.msk.bf16.gmra.mrb[20].mxu1 %vm340_vm1, %v2336_v47 }
 0x169   : > { %v2091_v49 = vpop.f32.mrb[0].mxu0  ;;  %v2117_v51 = vpop.f32.mrb[0].mxu1 }
 0x16a   : > { %v1480_v50 = vadd.f32 %v2091_v49, %v2654_v48  ;;  %v1189_v52 = vpop.f32.mrb[1].mxu0  ;;  %v1529_v53 = vadd.f32 %v2117_v51, %v2654_v48  ;;  %v1353_v55 = vpop.f32.mrb[1].mxu1 }
 0x16b   : > { %v1478_v54 = vadd.f32 %v2654_v48, %v1189_v52  ;;  %v2092_v56 = vpop.f32.mrb[2].mxu0  ;;  %v1527_v57 = vadd.f32 %v2654_v48, %v1353_v55  ;;  %v2118_v59 = vpop.f32.mrb[2].mxu1 }
 0x16c   : > { %1505 = vst.msk [vmem:[%s2659_s22 + $0x10] sm:$0xff] %vm1502_vm2, %v1480_v50  ;;  %v1481_v58 = vadd.f32 %v2092_v56, %v2654_v48  ;;  %v1192_v60 = vpop.f32.mrb[3].mxu0  ;;  %1880 = vst.msk [vmem:[%s2659_s22 + $0x28] sm:$0xff] %vm1502_vm2, %v1529_v53  ;;  %v1530_v61 = vadd.f32 %v2118_v59, %v2654_v48  ;;  %v1356_v63 = vpop.f32.mrb[3].mxu1 }
 0x16d   : > { %1503 = vst.msk [vmem:[%s2659_s22] sm:$0xff] %vm1502_vm2, %v1478_v54  ;;  %v1479_v62 = vadd.f32 %v2654_v48, %v1192_v60  ;;  %1878 = vst.msk [vmem:[%s2659_s22 + $0x18] sm:$0xff] %vm1502_vm2, %v1527_v57  ;;  %v1528_v0 = vadd.f32 %v2654_v48, %v1356_v63 }
 0x16e   : > { %1506 = vst.msk [vmem:[%s2659_s22 + $0x30] sm:$0xff] %vm1502_vm2, %v1481_v58  ;;  %1881 = vst.msk [vmem:[%s2659_s22 + $0x48] sm:$0xff] %vm1502_vm2, %v1530_v61 }
 0x16f   : > { %1504 = vst.msk [vmem:[%s2659_s22 + $0x8] sm:$0xff] %vm1502_vm2, %v1479_v62  ;;  %1879 = vst.msk [vmem:[%s2659_s22 + $0x20] sm:$0xff] %vm1502_vm2, %v1528_v0 }
 0x171   : > { %v2095_v1 = vpop.f32.mrb[4].mxu0  ;;  %v2121_v3 = vpop.f32.mrb[4].mxu1 }
 0x172   : > { %v1484_v2 = vadd.f32 %v2095_v1, %v2654_v48  ;;  %v1205_v4 = vpop.f32.mrb[5].mxu0  ;;  %v1533_v5 = vadd.f32 %v2121_v3, %v2654_v48  ;;  %v1369_v7 = vpop.f32.mrb[5].mxu1 }
 0x173   : > { %v1482_v6 = vadd.f32 %v2654_v48, %v1205_v4  ;;  %v2096_v8 = vpop.f32.mrb[6].mxu0  ;;  %v1531_v9 = vadd.f32 %v2654_v48, %v1369_v7  ;;  %v2122_v11 = vpop.f32.mrb[6].mxu1 }
 0x174   : > { %1509 = vst.msk [vmem:[%s2659_s22 + $0x60] sm:$0xff] %vm1502_vm2, %v1484_v2  ;;  %v1485_v10 = vadd.f32 %v2096_v8, %v2654_v48  ;;  %v1208_v12 = vpop.f32.mrb[7].mxu0  ;;  %1884 = vst.msk [vmem:[%s2659_s22 + $0x78] sm:$0xff] %vm1502_vm2, %v1533_v5  ;;  %v1534_v13 = vadd.f32 %v2122_v11, %v2654_v48  ;;  %v1372_v15 = vpop.f32.mrb[7].mxu1 }
 0x175   : > { %1507 = vst.msk [vmem:[%s2659_s22 + $0x38] sm:$0xff] %vm1502_vm2, %v1482_v6  ;;  %v1483_v14 = vadd.f32 %v2654_v48, %v1208_v12  ;;  %1882 = vst.msk [vmem:[%s2659_s22 + $0x50] sm:$0xff] %vm1502_vm2, %v1531_v9  ;;  %v1532_v16 = vadd.f32 %v2654_v48, %v1372_v15 }
 0x176   : > { %1510 = vst.msk [vmem:[%s2659_s22 + $0x68] sm:$0xff] %vm1502_vm2, %v1485_v10  ;;  %1885 = vst.msk [vmem:[%s2659_s22 + $0x80] sm:$0xff] %vm1502_vm2, %v1534_v13 }
 0x177   : > { %1508 = vst.msk [vmem:[%s2659_s22 + $0x40] sm:$0xff] %vm1502_vm2, %v1483_v14  ;;  %1883 = vst.msk [vmem:[%s2659_s22 + $0x58] sm:$0xff] %vm1502_vm2, %v1532_v16 }
 0x179   : > { %v2099_v17 = vpop.f32.mrb[8].mxu0  ;;  %v2125_v19 = vpop.f32.mrb[8].mxu1 }
 0x17a   : > { %v1488_v18 = vadd.f32 %v2099_v17, %v2654_v48  ;;  %v1221_v20 = vpop.f32.mrb[9].mxu0  ;;  %v1537_v21 = vadd.f32 %v2125_v19, %v2654_v48  ;;  %v1385_v23 = vpop.f32.mrb[9].mxu1 }
 0x17b   : > { %v1486_v22 = vadd.f32 %v2654_v48, %v1221_v20  ;;  %v2100_v24 = vpop.f32.mrb[10].mxu0  ;;  %v1535_v25 = vadd.f32 %v2654_v48, %v1385_v23  ;;  %v2126_v27 = vpop.f32.mrb[10].mxu1 }
 0x17c   : > { %1513 = vst.msk [vmem:[%s2659_s22 + $0x98] sm:$0xff] %vm1502_vm2, %v1488_v18  ;;  %v1489_v26 = vadd.f32 %v2100_v24, %v2654_v48  ;;  %v1224_v28 = vpop.f32.mrb[11].mxu0  ;;  %1888 = vst.msk [vmem:[%s2659_s22 + $0xb0] sm:$0xff] %vm1502_vm2, %v1537_v21  ;;  %v1538_v29 = vadd.f32 %v2126_v27, %v2654_v48  ;;  %v1388_v31 = vpop.f32.mrb[11].mxu1 }
 0x17d   : > { %1511 = vst.msk [vmem:[%s2659_s22 + $0x70] sm:$0xff] %vm1502_vm2, %v1486_v22  ;;  %v1487_v30 = vadd.f32 %v2654_v48, %v1224_v28  ;;  %1886 = vst.msk [vmem:[%s2659_s22 + $0x88] sm:$0xff] %vm1502_vm2, %v1535_v25  ;;  %v1536_v32 = vadd.f32 %v2654_v48, %v1388_v31 }
 0x17e   : > { %1514 = vst.msk [vmem:[%s2659_s22 + $0xa0] sm:$0xff] %vm1502_vm2, %v1489_v26  ;;  %1889 = vst.msk [vmem:[%s2659_s22 + $0xb8] sm:$0xff] %vm1502_vm2, %v1538_v29 }
 0x17f   : > { %1512 = vst.msk [vmem:[%s2659_s22 + $0x90] sm:$0xff] %vm1502_vm2, %v1487_v30  ;;  %1887 = vst.msk [vmem:[%s2659_s22 + $0xa8] sm:$0xff] %vm1502_vm2, %v1536_v32 }
 0x181   : > { %v2103_v33 = vpop.f32.mrb[12].mxu0  ;;  %v2129_v35 = vpop.f32.mrb[12].mxu1 }
 0x182   : > { %v1492_v34 = vadd.f32 %v2103_v33, %v2654_v48  ;;  %v1237_v36 = vpop.f32.mrb[13].mxu0  ;;  %v1541_v37 = vadd.f32 %v2129_v35, %v2654_v48  ;;  %v1401_v39 = vpop.f32.mrb[13].mxu1 }
 0x183   : > { %v1490_v38 = vadd.f32 %v2654_v48, %v1237_v36  ;;  %v2104_v40 = vpop.f32.mrb[14].mxu0  ;;  %v1539_v41 = vadd.f32 %v2654_v48, %v1401_v39  ;;  %v2130_v43 = vpop.f32.mrb[14].mxu1 }
 0x184   : > { %1517 = vst.msk [vmem:[%s2659_s22 + $0xd0] sm:$0xff] %vm1502_vm2, %v1492_v34  ;;  %v1493_v42 = vadd.f32 %v2104_v40, %v2654_v48  ;;  %v1240_v44 = vpop.f32.mrb[15].mxu0  ;;  %1892 = vst.msk [vmem:[%s2659_s22 + $0xe8] sm:$0xff] %vm1502_vm2, %v1541_v37  ;;  %v1542_v45 = vadd.f32 %v2130_v43, %v2654_v48  ;;  %v1404_v47 = vpop.f32.mrb[15].mxu1 }
 0x185   : > { %1515 = vst.msk [vmem:[%s2659_s22 + $0xc0] sm:$0xff] %vm1502_vm2, %v1490_v38  ;;  %v1491_v46 = vadd.f32 %v2654_v48, %v1240_v44  ;;  %1890 = vst.msk [vmem:[%s2659_s22 + $0xd8] sm:$0xff] %vm1502_vm2, %v1539_v41  ;;  %v1540_v49 = vadd.f32 %v2654_v48, %v1404_v47 }
 0x186   : > { %1518 = vst.msk [vmem:[%s2659_s22 + $0xf0] sm:$0xff] %vm1502_vm2, %v1493_v42  ;;  %1893 = vst.msk [vmem:[%s2659_s22 + $0x108] sm:$0xff] %vm1502_vm2, %v1542_v45 }
 0x187   : > { %1516 = vst.msk [vmem:[%s2659_s22 + $0xc8] sm:$0xff] %vm1502_vm2, %v1491_v46  ;;  %1891 = vst.msk [vmem:[%s2659_s22 + $0xe0] sm:$0xff] %vm1502_vm2, %v1540_v49 }
 0x189   : > { %v2107_v50 = vpop.f32.mrb[16].mxu0  ;;  %v2133_v52 = vpop.f32.mrb[16].mxu1 }
 0x18a   : > { %v1496_v51 = vadd.f32 %v2107_v50, %v2654_v48  ;;  %v1253_v53 = vpop.f32.mrb[17].mxu0  ;;  %v1545_v54 = vadd.f32 %v2133_v52, %v2654_v48  ;;  %v1417_v56 = vpop.f32.mrb[17].mxu1 }
 0x18b   : > { %v1494_v55 = vadd.f32 %v2654_v48, %v1253_v53  ;;  %v2108_v57 = vpop.f32.mrb[18].mxu0  ;;  %v1543_v58 = vadd.f32 %v2654_v48, %v1417_v56  ;;  %v2134_v60 = vpop.f32.mrb[18].mxu1 }
 0x18c   : > { %1521 = vst.msk [vmem:[%s2659_s22 + $0x120] sm:$0xff] %vm1502_vm2, %v1496_v51  ;;  %v1497_v59 = vadd.f32 %v2108_v57, %v2654_v48  ;;  %v1256_v61 = vpop.f32.mrb[19].mxu0  ;;  %1896 = vst.msk [vmem:[%s2659_s22 + $0x138] sm:$0xff] %vm1502_vm2, %v1545_v54  ;;  %v1546_v62 = vadd.f32 %v2134_v60, %v2654_v48  ;;  %v1420_v0 = vpop.f32.mrb[19].mxu1 }
 0x18d   : > { %1519 = vst.msk [vmem:[%s2659_s22 + $0xf8] sm:$0xff] %vm1502_vm2, %v1494_v55  ;;  %v1495_v63 = vadd.f32 %v2654_v48, %v1256_v61  ;;  %1894 = vst.msk [vmem:[%s2659_s22 + $0x110] sm:$0xff] %vm1502_vm2, %v1543_v58  ;;  %v1544_v1 = vadd.f32 %v2654_v48, %v1420_v0 }
 0x18e   : > { %1522 = vst.msk [vmem:[%s2659_s22 + $0x128] sm:$0xff] %vm1502_vm2, %v1497_v59  ;;  %1897 = vst.msk [vmem:[%s2659_s22 + $0x140] sm:$0xff] %vm1502_vm2, %v1546_v62 }
 0x18f   : > { %1520 = vst.msk [vmem:[%s2659_s22 + $0x100] sm:$0xff] %vm1502_vm2, %v1495_v63  ;;  %1895 = vst.msk [vmem:[%s2659_s22 + $0x118] sm:$0xff] %vm1502_vm2, %v1544_v1 }
 0x191   : > { %v2111_v2 = vpop.f32.mrb[20].mxu0  ;;  %v2137_v4 = vpop.f32.mrb[20].mxu1 }
 0x192   : > { %v1500_v3 = vadd.f32 %v2111_v2, %v2654_v48  ;;  %v1269_v5 = vpop.f32.mrb[21].mxu0  ;;  %v1549_v6 = vadd.f32 %v2137_v4, %v2654_v48  ;;  %v1433_v8 = vpop.f32.mrb[21].mxu1 }
 0x193   : > { %v1498_v7 = vadd.f32 %v2654_v48, %v1269_v5  ;;  %v2112_v9 = vpop.f32.mrb[22].mxu0  ;;  %v1547_v10 = vadd.f32 %v2654_v48, %v1433_v8  ;;  %v2138_v12 = vpop.f32.mrb[22].mxu1 }
 0x194   : > { %1525 = vst.msk [vmem:[%s2659_s22 + $0x158] sm:$0xff] %vm1502_vm2, %v1500_v3  ;;  %v1501_v11 = vadd.f32 %v2112_v9, %v2654_v48  ;;  %v1272_v13 = vpop.f32.mrb[23].mxu0  ;;  %1900 = vst.msk [vmem:[%s2659_s22 + $0x170] sm:$0xff] %vm1502_vm2, %v1549_v6  ;;  %v1550_v14 = vadd.f32 %v2138_v12, %v2654_v48  ;;  %v1436_v16 = vpop.f32.mrb[23].mxu1 }
 0x195   : > { %1523 = vst.msk [vmem:[%s2659_s22 + $0x130] sm:$0xff] %vm1502_vm2, %v1498_v7  ;;  %v1499_v15 = vadd.f32 %v2654_v48, %v1272_v13  ;;  %1898 = vst.msk [vmem:[%s2659_s22 + $0x148] sm:$0xff] %vm1502_vm2, %v1547_v10  ;;  %v1548_v17 = vadd.f32 %v2654_v48, %v1436_v16 }
 0x196   : > { %1526 = vst.msk [vmem:[%s2659_s22 + $0x160] sm:$0xff] %vm1502_vm2, %v1501_v11  ;;  %1901 = vst.msk [vmem:[%s2659_s22 + $0x178] sm:$0xff] %vm1502_vm2, %v1550_v14 }
 0x197   : > { %1524 = vst.msk [vmem:[%s2659_s22 + $0x150] sm:$0xff] %vm1502_vm2, %v1499_v15  ;;  %1899 = vst.msk [vmem:[%s2659_s22 + $0x168] sm:$0xff] %vm1502_vm2, %v1548_v17 }
 0x198 PF: > { %s14_s16 = sadd.s32 1, %s2407_s16   ;;  %s2832_s12 = smov %s2399_s14 }
 0x199   : > { %p11_p7 = scmp.ge.s32.totalorder %s14_s16, 8   ;;  %s2833_s13 = smov %s2403_s15 }
 0x19a   : > { %s2834_s14 = smov %s2837_s18  ;;  %s2835_s15 = smov %s2841_s19 }
 0x19b   :  { %13 = sbr.rel (!%p11_p7) target bundleno = 3 (0x3), region = 76 }
 0x1a2   :  { %1608 = vsyncpa [#allocation3], 1 }
 0x1a3   :  { %1610 = vsyncpa [#allocation3 + $0x1], 1 }

</bundles_post_ra>
